<compile_context>
chip_gen: v7x
topology: tpu7x:2x2x1
jax: 0.10.0
libtpu: 0.0.40
codegen_flags: <defaults>
</compile_context>

<pallas_src>
import functools

import jax
import jax.numpy as jnp
from jax import lax
from jax.experimental import pallas as pl
from jax.experimental.pallas import tpu as pltpu


def decoder_kernel(
    enc_out_ref,    # (B, L, 2H) f32
    enc_hid_ref,    # (B, 2H)    f32
    dec_in_ref,     # (B, 1)     int32
    w1_ref, b1_ref,             # (2H, H), (1, H)
    w2_ref, b2_ref,             # (2H, H), (1, H)
    emb_ref,                    # (V, E)
    attn_wh_ref,                # (H, max_len)  attn rows hitting enc_hid
    attn_we_ref,                # (E, max_len)  attn rows hitting embedding
    attn_b_ref,                 # (1, max_len)
    comb_we_ref,                # (E, E)        attn_combine rows hitting embedding
    comb_wh_ref,                # (H, E)        attn_combine rows hitting attn_applied
    comb_b_ref,                 # (1, E)
    wih_ref, whh_ref,           # (E, 3H), (H, 3H)
    bih_ref, bhh_ref,           # (1, 3H), (1, 3H)
    out_w_ref, out_b_ref,       # (H, Vp), (1, Vp)  vocab padded to lane-dense Vp
    logits_ref,     # out (dec_len, B, Vp) f32  raw output-projection logits
    hfinal_ref,     # out (B, H)           f32
    *, dec_len, hidden_dim,
):
    f32 = jnp.float32
    H = hidden_dim

    # ---------- loop-invariant work, hoisted off the serial decode chain ----------
    eh = enc_hid_ref[...]                                          # (B, 2H)
    B = eh.shape[0]
    enc_hid = jnp.dot(eh, w1_ref[...], preferred_element_type=f32) + b1_ref[...]  # (B, H)

    eo = enc_out_ref[...]                                          # (B, L, 2H)
    L = eo.shape[1]
    enc_out = (
        jnp.dot(eo.reshape(B * L, 2 * H), w2_ref[...], preferred_element_type=f32)
        + b2_ref[...]
    ).reshape(B, L, H)                                             # (B, L, H)

    emb_tab = emb_ref[...]                                         # (V, E)
    V = emb_tab.shape[0]
    attn_we = attn_we_ref[...]
    comb_we = comb_we_ref[...]
    comb_wh = comb_wh_ref[...]
    comb_b = comb_b_ref[...]
    wih = wih_ref[...]
    whh = whh_ref[...]
    bih = bih_ref[...]
    bhh = bhh_ref[...]
    out_w = out_w_ref[...]
    out_b = out_b_ref[...]

    # enc_hid contribution to the attention logits is the same every decode step.
    attn_const = (jnp.dot(enc_hid, attn_wh_ref[...], preferred_element_type=f32)
                  + attn_b_ref[...])                               # (B, max_len)

    # one-hot iota is loop-invariant; JAX does not CSE broadcast/iota inside loops.
    iota_v = lax.broadcasted_iota(jnp.int32, (B, V), 1)

    def step(i, carry):
        h, ids = carry                                             # (B, H) f32, (B, 1) int32

        # embedding lookup as one-hot matmul (gather-free, MXU friendly)
        onehot = (iota_v == ids).astype(f32)                       # (B, V)
        emb = jnp.dot(onehot, emb_tab, preferred_element_type=f32)  # (B, E)

        # attention over encoder positions (concat replaced by precomputed const + matmul)
        a_logits = attn_const + jnp.dot(emb, attn_we, preferred_element_type=f32)
        a_max = jnp.max(a_logits, axis=1, keepdims=True)
        a_exp = jnp.exp(a_logits - a_max)
        aw = a_exp / jnp.sum(a_exp, axis=1, keepdims=True)         # softmax (B, L)

        # bmm((B,1,L),(B,L,H)) -> (B, H)
        attn_applied = jnp.sum(aw[:, :, None] * enc_out, axis=1)

        # attn_combine + relu (concat replaced by split matmuls + add)
        x = (jnp.dot(emb, comb_we, preferred_element_type=f32)
             + jnp.dot(attn_applied, comb_wh, preferred_element_type=f32)
             + comb_b)
        x = jnp.maximum(x, 0.0)                                    # (B, E)

        # GRU cell (gate order r, z, n — matches torch.nn.GRU)
        gi = jnp.dot(x, wih, preferred_element_type=f32) + bih
        gh = jnp.dot(h, whh, preferred_element_type=f32) + bhh
        r = jax.nn.sigmoid(gi[:, :H] + gh[:, :H])
        z = jax.nn.sigmoid(gi[:, H:2 * H] + gh[:, H:2 * H])
        n = jnp.tanh(gi[:, 2 * H:] + r * gh[:, 2 * H:])
        h_new = (1.0 - z) * n + z * h                              # (B, H)

        # output projection; argmax on raw logits (monotone shift preserves argmax,
        # padded columns biased to -1e30).  log_softmax is deferred to the wrapper,
        # so only this matmul + argmax sit on the carry chain.
        logits = jnp.dot(h_new, out_w, preferred_element_type=f32) + out_b  # (B, Vp)
        top = jnp.argmax(logits, axis=1).astype(jnp.int32)         # (B,)

        logits_ref[i] = logits                                     # lane-dense (B, Vp) store
        return (h_new, top[:, None])

    h0 = enc_hid                       # dec_hidden starts as projected enc_hidden
    ids0 = dec_in_ref[...]
    # dec_len is a static Python int: fully unroll so the scheduler can overlap the
    # off-critical-path work (stores, one-hot build, bias adds) with the next step.
    h_final, _ = lax.fori_loop(0, dec_len, step, (h0, ids0), unroll=True)
    hfinal_ref[...] = h_final


def make_params(key, vocab_size, embedding_dim, hidden_dim, max_len):
    H, E, V = hidden_dim, embedding_dim, vocab_size
    ks = jax.random.split(key, 15)

    def init(k, shape, scale=0.1):
        return jax.random.normal(k, shape, jnp.float32) * scale

    return dict(
        w1=init(ks[0], (2 * H, H)),       b1=init(ks[1], (1, H)),
        w2=init(ks[2], (2 * H, H)),       b2=init(ks[3], (1, H)),
        emb=init(ks[4], (V, E), 1.0),
        attn_w=init(ks[5], (H + E, max_len)), attn_b=init(ks[6], (1, max_len)),
        comb_w=init(ks[7], (H + E, E)),   comb_b=init(ks[8], (1, E)),
        gru_wih=init(ks[9], (E, 3 * H)),  gru_whh=init(ks[10], (H, 3 * H)),
        gru_bih=init(ks[11], (1, 3 * H)), gru_bhh=init(ks[12], (1, 3 * H)),
        out_w=init(ks[13], (H, V)),       out_b=init(ks[14], (1, V)),
    )


def decoder_forward(params, enc_output, enc_hidden, dec_input, dec_len,
                    target=None, val=True, *, hidden_dim):
    # TODO(synk): PyTorch forward uses host-side random.random() for teacher forcing;
    # this kernel implements the deterministic val=True / greedy branch only (`target` unused).
    del target, val
    B = enc_hidden.shape[1]
    H = hidden_dim
    V, E = params["emb"].shape
    Vp = ((V + 127) // 128) * 128          # lane-dense padded vocab for the logits store

    enc_hidden2 = enc_hidden.reshape(B, 2 * H).astype(jnp.float32)
    enc_output = enc_output.astype(jnp.float32)
    dec_input = dec_input.reshape(B, 1).astype(jnp.int32)

    # Split concat-style weights so the kernel avoids lane-axis concats.
    attn_wh = params["attn_w"][:H]         # rows multiplying enc_hid
    attn_we = params["attn_w"][H:]         # rows multiplying the embedding
    comb_we = params["comb_w"][:E]         # rows multiplying the embedding
    comb_wh = params["comb_w"][E:]         # rows multiplying attn_applied

    # Pad output projection to a 128-lane multiple; padded bias = -1e30 so the
    # in-kernel argmax and the wrapper softmax/argmax never pick padding columns.
    out_w_p = jnp.pad(params["out_w"], ((0, 0), (0, Vp - V)))
    out_b_p = jnp.pad(params["out_b"], ((0, 0), (0, Vp - V)), constant_values=-1e30)

    weights = (
        params["w1"], params["b1"], params["w2"], params["b2"], params["emb"],
        attn_wh, attn_we, params["attn_b"],
        comb_we, comb_wh, params["comb_b"],
        params["gru_wih"], params["gru_whh"], params["gru_bih"], params["gru_bhh"],
        out_w_p, out_b_p,
    )
    n_inputs = 3 + len(weights)

    logits_p, h_final = pl.pallas_call(
        functools.partial(decoder_kernel, dec_len=dec_len, hidden_dim=H),
        out_shape=(
            jax.ShapeDtypeStruct((dec_len, B, Vp), jnp.float32),
            jax.ShapeDtypeStruct((B, H), jnp.float32),
        ),
        in_specs=[pl.BlockSpec(memory_space=pltpu.MemorySpace.VMEM)] * n_inputs,
        out_specs=(
            pl.BlockSpec(memory_space=pltpu.MemorySpace.VMEM),
            pl.BlockSpec(memory_space=pltpu.MemorySpace.VMEM),
        ),
    )(enc_output, enc_hidden2, dec_input, *weights)

    # log_softmax / greedy ids recomputed outside the serial kernel loop (cheap, batched).
    logits = logits_p[:, :, :V]                                    # (dec_len, B, V)
    logp = jax.nn.log_softmax(logits, axis=-1)
    decoded = jnp.argmax(logits, axis=-1).astype(jnp.float32).T    # (B, dec_len)
    dec_hidden = h_final[None, :, :]                               # (1, B, H)
    decoded_outputs = jnp.transpose(logp, (1, 0, 2))               # (B, dec_len, V)
    return decoded, dec_hidden, decoded_outputs


if __name__ == "__main__":
    # Small shapes consistent with the module:
    vocab_size, embedding_dim, hidden_dim = 24, 16, 32
    batch, enc_seq_len, dec_len = 2, 8, 6
    max_len = enc_seq_len  # bmm(attn_weights, enc_output) requires max_len == enc_seq_len

    key = jax.random.PRNGKey(0)
    kp, k1, k2, k3, k4 = jax.random.split(key, 5)

    params = make_params(kp, vocab_size, embedding_dim, hidden_dim, max_len)

    enc_output = jax.random.normal(k1, (batch, enc_seq_len, 2 * hidden_dim), jnp.float32)
    enc_hidden = jax.random.normal(k2, (1, batch, 2 * hidden_dim), jnp.float32)
    dec_input = jax.random.randint(k3, (batch, 1), 0, vocab_size, jnp.int32)
    target = jax.random.randint(k4, (batch, dec_len), 0, vocab_size, jnp.int32)

    decoded, dec_hidden, decoded_outputs = decoder_forward(
        params, enc_output, enc_hidden, dec_input, dec_len,
        target=target, val=True, hidden_dim=hidden_dim,
    )
    jax.block_until_ready((decoded, dec_hidden, decoded_outputs))

    assert decoded.shape == (batch, dec_len)
    assert dec_hidden.shape == (1, batch, hidden_dim)
    assert decoded_outputs.shape == (batch, dec_len, vocab_size)
    print("KERNEL_OK")
</pallas_src>

<mosaic_0001>
module attributes {stable_mosaic.version = 11 : i64} {
  func.func @decoder_kernel(%arg0: memref<2x8x64xf32, #tpu.memory_space<vmem>>, %arg1: memref<2x64xf32, #tpu.memory_space<vmem>>, %arg2: memref<2x1xi32, #tpu.memory_space<vmem>>, %arg3: memref<64x32xf32, #tpu.memory_space<vmem>>, %arg4: memref<1x32xf32, #tpu.memory_space<vmem>>, %arg5: memref<64x32xf32, #tpu.memory_space<vmem>>, %arg6: memref<1x32xf32, #tpu.memory_space<vmem>>, %arg7: memref<24x16xf32, #tpu.memory_space<vmem>>, %arg8: memref<32x8xf32, #tpu.memory_space<vmem>>, %arg9: memref<16x8xf32, #tpu.memory_space<vmem>>, %arg10: memref<1x8xf32, #tpu.memory_space<vmem>>, %arg11: memref<16x16xf32, #tpu.memory_space<vmem>>, %arg12: memref<32x16xf32, #tpu.memory_space<vmem>>, %arg13: memref<1x16xf32, #tpu.memory_space<vmem>>, %arg14: memref<16x96xf32, #tpu.memory_space<vmem>>, %arg15: memref<32x96xf32, #tpu.memory_space<vmem>>, %arg16: memref<1x96xf32, #tpu.memory_space<vmem>>, %arg17: memref<1x96xf32, #tpu.memory_space<vmem>>, %arg18: memref<32x128xf32, #tpu.memory_space<vmem>>, %arg19: memref<1x128xf32, #tpu.memory_space<vmem>>, %arg20: memref<6x2x128xf32, #tpu.memory_space<vmem>>, %arg21: memref<2x32xf32, #tpu.memory_space<vmem>>) attributes {dimension_semantics = [], scalar_prefetch = 0 : i64, scratch_operands = 0 : i64, tpu.core_type = #tpu.core_type<tc>} {
    %c0 = arith.constant 0 : index
    %c0_0 = arith.constant 0 : index
    %0 = vector.load %arg1[%c0, %c0_0] : memref<2x64xf32, #tpu.memory_space<vmem>>, vector<2x64xf32>
    %c0_1 = arith.constant 0 : index
    %c0_2 = arith.constant 0 : index
    %1 = vector.load %arg3[%c0_1, %c0_2] : memref<64x32xf32, #tpu.memory_space<vmem>>, vector<64x32xf32>
    %cst = arith.constant dense<0.000000e+00> : vector<2x32xf32>
    %2 = tpu.matmul %0, %1, %cst {dimension_numbers = #tpu.dot_dimension_numbers<[1], [0], [0], [1], [0, 0, 1, 1], [], []>} : vector<2x64xf32>, vector<64x32xf32>, vector<2x32xf32> -> vector<2x32xf32>
    %c0_3 = arith.constant 0 : index
    %c0_4 = arith.constant 0 : index
    %3 = vector.load %arg4[%c0_3, %c0_4] : memref<1x32xf32, #tpu.memory_space<vmem>>, vector<1x32xf32>
    %4 = vector.broadcast %3 : vector<1x32xf32> to vector<2x32xf32>
    %5 = arith.addf %2, %4 : vector<2x32xf32>
    %c0_5 = arith.constant 0 : index
    %c0_6 = arith.constant 0 : index
    %c0_7 = arith.constant 0 : index
    %6 = vector.load %arg0[%c0_5, %c0_6, %c0_7] : memref<2x8x64xf32, #tpu.memory_space<vmem>>, vector<2x8x64xf32>
    %7 = vector.shape_cast %6 : vector<2x8x64xf32> to vector<16x64xf32>
    %c0_8 = arith.constant 0 : index
    %c0_9 = arith.constant 0 : index
    %8 = vector.load %arg5[%c0_8, %c0_9] : memref<64x32xf32, #tpu.memory_space<vmem>>, vector<64x32xf32>
    %cst_10 = arith.constant dense<0.000000e+00> : vector<16x32xf32>
    %9 = tpu.matmul %7, %8, %cst_10 {dimension_numbers = #tpu.dot_dimension_numbers<[1], [0], [0], [1], [0, 0, 1, 1], [], []>} : vector<16x64xf32>, vector<64x32xf32>, vector<16x32xf32> -> vector<16x32xf32>
    %c0_11 = arith.constant 0 : index
    %c0_12 = arith.constant 0 : index
    %10 = vector.load %arg6[%c0_11, %c0_12] : memref<1x32xf32, #tpu.memory_space<vmem>>, vector<1x32xf32>
    %11 = vector.broadcast %10 : vector<1x32xf32> to vector<16x32xf32>
    %12 = arith.addf %9, %11 : vector<16x32xf32>
    %13 = vector.shape_cast %12 : vector<16x32xf32> to vector<2x8x32xf32>
    %c0_13 = arith.constant 0 : index
    %c0_14 = arith.constant 0 : index
    %14 = vector.load %arg7[%c0_13, %c0_14] : memref<24x16xf32, #tpu.memory_space<vmem>>, vector<24x16xf32>
    %c0_15 = arith.constant 0 : index
    %c0_16 = arith.constant 0 : index
    %15 = vector.load %arg9[%c0_15, %c0_16] : memref<16x8xf32, #tpu.memory_space<vmem>>, vector<16x8xf32>
    %c0_17 = arith.constant 0 : index
    %c0_18 = arith.constant 0 : index
    %16 = vector.load %arg11[%c0_17, %c0_18] : memref<16x16xf32, #tpu.memory_space<vmem>>, vector<16x16xf32>
    %c0_19 = arith.constant 0 : index
    %c0_20 = arith.constant 0 : index
    %17 = vector.load %arg12[%c0_19, %c0_20] : memref<32x16xf32, #tpu.memory_space<vmem>>, vector<32x16xf32>
    %c0_21 = arith.constant 0 : index
    %c0_22 = arith.constant 0 : index
    %18 = vector.load %arg13[%c0_21, %c0_22] : memref<1x16xf32, #tpu.memory_space<vmem>>, vector<1x16xf32>
    %c0_23 = arith.constant 0 : index
    %c0_24 = arith.constant 0 : index
    %19 = vector.load %arg14[%c0_23, %c0_24] : memref<16x96xf32, #tpu.memory_space<vmem>>, vector<16x96xf32>
    %c0_25 = arith.constant 0 : index
    %c0_26 = arith.constant 0 : index
    %20 = vector.load %arg15[%c0_25, %c0_26] : memref<32x96xf32, #tpu.memory_space<vmem>>, vector<32x96xf32>
    %c0_27 = arith.constant 0 : index
    %c0_28 = arith.constant 0 : index
    %21 = vector.load %arg16[%c0_27, %c0_28] : memref<1x96xf32, #tpu.memory_space<vmem>>, vector<1x96xf32>
    %c0_29 = arith.constant 0 : index
    %c0_30 = arith.constant 0 : index
    %22 = vector.load %arg17[%c0_29, %c0_30] : memref<1x96xf32, #tpu.memory_space<vmem>>, vector<1x96xf32>
    %c0_31 = arith.constant 0 : index
    %c0_32 = arith.constant 0 : index
    %23 = vector.load %arg18[%c0_31, %c0_32] : memref<32x128xf32, #tpu.memory_space<vmem>>, vector<32x128xf32>
    %c0_33 = arith.constant 0 : index
    %c0_34 = arith.constant 0 : index
    %24 = vector.load %arg19[%c0_33, %c0_34] : memref<1x128xf32, #tpu.memory_space<vmem>>, vector<1x128xf32>
    %c0_35 = arith.constant 0 : index
    %c0_36 = arith.constant 0 : index
    %25 = vector.load %arg8[%c0_35, %c0_36] : memref<32x8xf32, #tpu.memory_space<vmem>>, vector<32x8xf32>
    %cst_37 = arith.constant dense<0.000000e+00> : vector<2x8xf32>
    %26 = tpu.matmul %5, %25, %cst_37 {dimension_numbers = #tpu.dot_dimension_numbers<[1], [0], [0], [1], [0, 0, 1, 1], [], []>} : vector<2x32xf32>, vector<32x8xf32>, vector<2x8xf32> -> vector<2x8xf32>
    %c0_38 = arith.constant 0 : index
    %c0_39 = arith.constant 0 : index
    %27 = vector.load %arg10[%c0_38, %c0_39] : memref<1x8xf32, #tpu.memory_space<vmem>>, vector<1x8xf32>
    %28 = vector.broadcast %27 : vector<1x8xf32> to vector<2x8xf32>
    %29 = arith.addf %26, %28 : vector<2x8xf32>
    %30 = tpu.iota {dimensions = array<i32: 1>} : vector<2x24xi32>
    %c0_40 = arith.constant 0 : index
    %c0_41 = arith.constant 0 : index
    %31 = vector.load %arg2[%c0_40, %c0_41] : memref<2x1xi32, #tpu.memory_space<vmem>>, vector<2x1xi32>
    %c0_i32 = arith.constant 0 : i32
    %32 = vector.broadcast %31 : vector<2x1xi32> to vector<2x24xi32>
    %33 = arith.cmpi eq, %30, %32 : vector<2x24xi32>
    %34 = arith.extui %33 : vector<2x24xi1> to vector<2x24xi32>
    %35 = arith.sitofp %34 : vector<2x24xi32> to vector<2x24xf32>
    %cst_42 = arith.constant dense<0.000000e+00> : vector<2x16xf32>
    %36 = tpu.matmul %35, %14, %cst_42 {dimension_numbers = #tpu.dot_dimension_numbers<[1], [0], [0], [1], [0, 0, 1, 1], [], []>} : vector<2x24xf32>, vector<24x16xf32>, vector<2x16xf32> -> vector<2x16xf32>
    %cst_43 = arith.constant dense<0.000000e+00> : vector<2x8xf32>
    %37 = tpu.matmul %36, %15, %cst_43 {dimension_numbers = #tpu.dot_dimension_numbers<[1], [0], [0], [1], [0, 0, 1, 1], [], []>} : vector<2x16xf32>, vector<16x8xf32>, vector<2x8xf32> -> vector<2x8xf32>
    %38 = arith.addf %29, %37 : vector<2x8xf32>
    %cst_44 = arith.constant dense<0xFF800000> : vector<2xf32>
    %39 = vector.multi_reduction <maximumf>, %38, %cst_44 [1] : vector<2x8xf32> to vector<2xf32>
    %40 = vector.shape_cast %39 : vector<2xf32> to vector<2x1xf32>
    %41 = vector.broadcast %40 : vector<2x1xf32> to vector<2x8xf32>
    %42 = arith.subf %38, %41 : vector<2x8xf32>
    %43 = math.exp %42 : vector<2x8xf32>
    %cst_45 = arith.constant dense<0.000000e+00> : vector<2xf32>
    %44 = vector.multi_reduction <add>, %43, %cst_45 [1] : vector<2x8xf32> to vector<2xf32>
    %45 = vector.shape_cast %44 : vector<2xf32> to vector<2x1xf32>
    %46 = vector.broadcast %45 : vector<2x1xf32> to vector<2x8xf32>
    %47 = arith.divf %43, %46 : vector<2x8xf32>
    %48 = vector.shape_cast %47 : vector<2x8xf32> to vector<2x8x1xf32>
    %49 = vector.broadcast %48 : vector<2x8x1xf32> to vector<2x8x32xf32>
    %50 = arith.mulf %49, %13 : vector<2x8x32xf32>
    %cst_46 = arith.constant dense<0.000000e+00> : vector<2x32xf32>
    %51 = vector.multi_reduction <add>, %50, %cst_46 [1] : vector<2x8x32xf32> to vector<2x32xf32>
    %cst_47 = arith.constant dense<0.000000e+00> : vector<2x16xf32>
    %52 = tpu.matmul %36, %16, %cst_47 {dimension_numbers = #tpu.dot_dimension_numbers<[1], [0], [0], [1], [0, 0, 1, 1], [], []>} : vector<2x16xf32>, vector<16x16xf32>, vector<2x16xf32> -> vector<2x16xf32>
    %cst_48 = arith.constant dense<0.000000e+00> : vector<2x16xf32>
    %53 = tpu.matmul %51, %17, %cst_48 {dimension_numbers = #tpu.dot_dimension_numbers<[1], [0], [0], [1], [0, 0, 1, 1], [], []>} : vector<2x32xf32>, vector<32x16xf32>, vector<2x16xf32> -> vector<2x16xf32>
    %54 = arith.addf %52, %53 : vector<2x16xf32>
    %55 = vector.broadcast %18 : vector<1x16xf32> to vector<2x16xf32>
    %56 = arith.addf %54, %55 : vector<2x16xf32>
    %cst_49 = arith.constant 0.000000e+00 : f32
    %57 = vector.broadcast %cst_49 : f32 to vector<2x16xf32>
    %58 = arith.maximumf %56, %57 : vector<2x16xf32>
    %cst_50 = arith.constant dense<0.000000e+00> : vector<2x96xf32>
    %59 = tpu.matmul %58, %19, %cst_50 {dimension_numbers = #tpu.dot_dimension_numbers<[1], [0], [0], [1], [0, 0, 1, 1], [], []>} : vector<2x16xf32>, vector<16x96xf32>, vector<2x96xf32> -> vector<2x96xf32>
    %60 = vector.broadcast %21 : vector<1x96xf32> to vector<2x96xf32>
    %61 = arith.addf %59, %60 : vector<2x96xf32>
    %cst_51 = arith.constant dense<0.000000e+00> : vector<2x96xf32>
    %62 = tpu.matmul %5, %20, %cst_51 {dimension_numbers = #tpu.dot_dimension_numbers<[1], [0], [0], [1], [0, 0, 1, 1], [], []>} : vector<2x32xf32>, vector<32x96xf32>, vector<2x96xf32> -> vector<2x96xf32>
    %63 = vector.broadcast %22 : vector<1x96xf32> to vector<2x96xf32>
    %64 = arith.addf %62, %63 : vector<2x96xf32>
    %65 = vector.extract_strided_slice %61 {offsets = [0, 0], sizes = [2, 32], strides = [1, 1]} : vector<2x96xf32> to vector<2x32xf32>
    %66 = vector.extract_strided_slice %64 {offsets = [0, 0], sizes = [2, 32], strides = [1, 1]} : vector<2x96xf32> to vector<2x32xf32>
    %67 = arith.addf %65, %66 : vector<2x32xf32>
    %68 = arith.negf %67 : vector<2x32xf32>
    %69 = math.exp %68 : vector<2x32xf32>
    %cst_52 = arith.constant 1.000000e+00 : f32
    %70 = vector.broadcast %cst_52 : f32 to vector<2x32xf32>
    %71 = arith.addf %70, %69 : vector<2x32xf32>
    %72 = arith.divf %70, %71 : vector<2x32xf32>
    %73 = vector.extract_strided_slice %61 {offsets = [0, 32], sizes = [2, 32], strides = [1, 1]} : vector<2x96xf32> to vector<2x32xf32>
    %74 = vector.extract_strided_slice %64 {offsets = [0, 32], sizes = [2, 32], strides = [1, 1]} : vector<2x96xf32> to vector<2x32xf32>
    %75 = arith.addf %73, %74 : vector<2x32xf32>
    %76 = arith.negf %75 : vector<2x32xf32>
    %77 = math.exp %76 : vector<2x32xf32>
    %cst_53 = arith.constant 1.000000e+00 : f32
    %78 = vector.broadcast %cst_53 : f32 to vector<2x32xf32>
    %79 = arith.addf %78, %77 : vector<2x32xf32>
    %80 = arith.divf %78, %79 : vector<2x32xf32>
    %81 = vector.extract_strided_slice %61 {offsets = [0, 64], sizes = [2, 32], strides = [1, 1]} : vector<2x96xf32> to vector<2x32xf32>
    %82 = vector.extract_strided_slice %64 {offsets = [0, 64], sizes = [2, 32], strides = [1, 1]} : vector<2x96xf32> to vector<2x32xf32>
    %83 = arith.mulf %72, %82 : vector<2x32xf32>
    %84 = arith.addf %81, %83 : vector<2x32xf32>
    %85 = math.tanh %84 : vector<2x32xf32>
    %cst_54 = arith.constant 1.000000e+00 : f32
    %86 = vector.broadcast %cst_54 : f32 to vector<2x32xf32>
    %87 = arith.subf %86, %80 : vector<2x32xf32>
    %88 = arith.mulf %87, %85 : vector<2x32xf32>
    %89 = arith.mulf %80, %5 : vector<2x32xf32>
    %90 = arith.addf %88, %89 : vector<2x32xf32>
    %cst_55 = arith.constant dense<0.000000e+00> : vector<2x128xf32>
    %91 = tpu.matmul %90, %23, %cst_55 {dimension_numbers = #tpu.dot_dimension_numbers<[1], [0], [0], [1], [0, 0, 1, 1], [], []>} : vector<2x32xf32>, vector<32x128xf32>, vector<2x128xf32> -> vector<2x128xf32>
    %92 = vector.broadcast %24 : vector<1x128xf32> to vector<2x128xf32>
    %93 = arith.addf %91, %92 : vector<2x128xf32>
    %94 = tpu.reduce_index %93 {axis = 1 : i32, kind = #tpu.reduction_kind<arg_max>} : vector<2x128xf32> -> vector<2xi32>
    %95 = arith.index_cast %c0_i32 : i32 to index
    %c0_56 = arith.constant 0 : index
    %c0_57 = arith.constant 0 : index
    %96 = vector.load %arg20[%95, %c0_56, %c0_57] : memref<6x2x128xf32, #tpu.memory_space<vmem>>, vector<1x2x128xf32>
    %97 = vector.shape_cast %96 : vector<1x2x128xf32> to vector<2x128xf32>
    %98 = vector.shape_cast %93 : vector<2x128xf32> to vector<1x2x128xf32>
    tpu.vector_store %arg20[%95, %c0_56, %c0_57], %98 {strides = array<i32>} : memref<6x2x128xf32, #tpu.memory_space<vmem>>, vector<1x2x128xf32>,
    %99 = vector.shape_cast %94 : vector<2xi32> to vector<2x1xi32>
    %c1_i32 = arith.constant 1 : i32
    %100 = vector.broadcast %99 : vector<2x1xi32> to vector<2x24xi32>
    %101 = arith.cmpi eq, %30, %100 : vector<2x24xi32>
    %102 = arith.extui %101 : vector<2x24xi1> to vector<2x24xi32>
    %103 = arith.sitofp %102 : vector<2x24xi32> to vector<2x24xf32>
    %cst_58 = arith.constant dense<0.000000e+00> : vector<2x16xf32>
    %104 = tpu.matmul %103, %14, %cst_58 {dimension_numbers = #tpu.dot_dimension_numbers<[1], [0], [0], [1], [0, 0, 1, 1], [], []>} : vector<2x24xf32>, vector<24x16xf32>, vector<2x16xf32> -> vector<2x16xf32>
    %cst_59 = arith.constant dense<0.000000e+00> : vector<2x8xf32>
    %105 = tpu.matmul %104, %15, %cst_59 {dimension_numbers = #tpu.dot_dimension_numbers<[1], [0], [0], [1], [0, 0, 1, 1], [], []>} : vector<2x16xf32>, vector<16x8xf32>, vector<2x8xf32> -> vector<2x8xf32>
    %106 = arith.addf %29, %105 : vector<2x8xf32>
    %cst_60 = arith.constant dense<0xFF800000> : vector<2xf32>
    %107 = vector.multi_reduction <maximumf>, %106, %cst_60 [1] : vector<2x8xf32> to vector<2xf32>
    %108 = vector.shape_cast %107 : vector<2xf32> to vector<2x1xf32>
    %109 = vector.broadcast %108 : vector<2x1xf32> to vector<2x8xf32>
    %110 = arith.subf %106, %109 : vector<2x8xf32>
    %111 = math.exp %110 : vector<2x8xf32>
    %cst_61 = arith.constant dense<0.000000e+00> : vector<2xf32>
    %112 = vector.multi_reduction <add>, %111, %cst_61 [1] : vector<2x8xf32> to vector<2xf32>
    %113 = vector.shape_cast %112 : vector<2xf32> to vector<2x1xf32>
    %114 = vector.broadcast %113 : vector<2x1xf32> to vector<2x8xf32>
    %115 = arith.divf %111, %114 : vector<2x8xf32>
    %116 = vector.shape_cast %115 : vector<2x8xf32> to vector<2x8x1xf32>
    %117 = vector.broadcast %116 : vector<2x8x1xf32> to vector<2x8x32xf32>
    %118 = arith.mulf %117, %13 : vector<2x8x32xf32>
    %cst_62 = arith.constant dense<0.000000e+00> : vector<2x32xf32>
    %119 = vector.multi_reduction <add>, %118, %cst_62 [1] : vector<2x8x32xf32> to vector<2x32xf32>
    %cst_63 = arith.constant dense<0.000000e+00> : vector<2x16xf32>
    %120 = tpu.matmul %104, %16, %cst_63 {dimension_numbers = #tpu.dot_dimension_numbers<[1], [0], [0], [1], [0, 0, 1, 1], [], []>} : vector<2x16xf32>, vector<16x16xf32>, vector<2x16xf32> -> vector<2x16xf32>
    %cst_64 = arith.constant dense<0.000000e+00> : vector<2x16xf32>
    %121 = tpu.matmul %119, %17, %cst_64 {dimension_numbers = #tpu.dot_dimension_numbers<[1], [0], [0], [1], [0, 0, 1, 1], [], []>} : vector<2x32xf32>, vector<32x16xf32>, vector<2x16xf32> -> vector<2x16xf32>
    %122 = arith.addf %120, %121 : vector<2x16xf32>
    %123 = vector.broadcast %18 : vector<1x16xf32> to vector<2x16xf32>
    %124 = arith.addf %122, %123 : vector<2x16xf32>
    %cst_65 = arith.constant 0.000000e+00 : f32
    %125 = vector.broadcast %cst_65 : f32 to vector<2x16xf32>
    %126 = arith.maximumf %124, %125 : vector<2x16xf32>
    %cst_66 = arith.constant dense<0.000000e+00> : vector<2x96xf32>
    %127 = tpu.matmul %126, %19, %cst_66 {dimension_numbers = #tpu.dot_dimension_numbers<[1], [0], [0], [1], [0, 0, 1, 1], [], []>} : vector<2x16xf32>, vector<16x96xf32>, vector<2x96xf32> -> vector<2x96xf32>
    %128 = vector.broadcast %21 : vector<1x96xf32> to vector<2x96xf32>
    %129 = arith.addf %127, %128 : vector<2x96xf32>
    %cst_67 = arith.constant dense<0.000000e+00> : vector<2x96xf32>
    %130 = tpu.matmul %90, %20, %cst_67 {dimension_numbers = #tpu.dot_dimension_numbers<[1], [0], [0], [1], [0, 0, 1, 1], [], []>} : vector<2x32xf32>, vector<32x96xf32>, vector<2x96xf32> -> vector<2x96xf32>
    %131 = vector.broadcast %22 : vector<1x96xf32> to vector<2x96xf32>
    %132 = arith.addf %130, %131 : vector<2x96xf32>
    %133 = vector.extract_strided_slice %129 {offsets = [0, 0], sizes = [2, 32], strides = [1, 1]} : vector<2x96xf32> to vector<2x32xf32>
    %134 = vector.extract_strided_slice %132 {offsets = [0, 0], sizes = [2, 32], strides = [1, 1]} : vector<2x96xf32> to vector<2x32xf32>
    %135 = arith.addf %133, %134 : vector<2x32xf32>
    %136 = arith.negf %135 : vector<2x32xf32>
    %137 = math.exp %136 : vector<2x32xf32>
    %cst_68 = arith.constant 1.000000e+00 : f32
    %138 = vector.broadcast %cst_68 : f32 to vector<2x32xf32>
    %139 = arith.addf %138, %137 : vector<2x32xf32>
    %140 = arith.divf %138, %139 : vector<2x32xf32>
    %141 = vector.extract_strided_slice %129 {offsets = [0, 32], sizes = [2, 32], strides = [1, 1]} : vector<2x96xf32> to vector<2x32xf32>
    %142 = vector.extract_strided_slice %132 {offsets = [0, 32], sizes = [2, 32], strides = [1, 1]} : vector<2x96xf32> to vector<2x32xf32>
    %143 = arith.addf %141, %142 : vector<2x32xf32>
    %144 = arith.negf %143 : vector<2x32xf32>
    %145 = math.exp %144 : vector<2x32xf32>
    %cst_69 = arith.constant 1.000000e+00 : f32
    %146 = vector.broadcast %cst_69 : f32 to vector<2x32xf32>
    %147 = arith.addf %146, %145 : vector<2x32xf32>
    %148 = arith.divf %146, %147 : vector<2x32xf32>
    %149 = vector.extract_strided_slice %129 {offsets = [0, 64], sizes = [2, 32], strides = [1, 1]} : vector<2x96xf32> to vector<2x32xf32>
    %150 = vector.extract_strided_slice %132 {offsets = [0, 64], sizes = [2, 32], strides = [1, 1]} : vector<2x96xf32> to vector<2x32xf32>
    %151 = arith.mulf %140, %150 : vector<2x32xf32>
    %152 = arith.addf %149, %151 : vector<2x32xf32>
    %153 = math.tanh %152 : vector<2x32xf32>
    %cst_70 = arith.constant 1.000000e+00 : f32
    %154 = vector.broadcast %cst_70 : f32 to vector<2x32xf32>
    %155 = arith.subf %154, %148 : vector<2x32xf32>
    %156 = arith.mulf %155, %153 : vector<2x32xf32>
    %157 = arith.mulf %148, %90 : vector<2x32xf32>
    %158 = arith.addf %156, %157 : vector<2x32xf32>
    %cst_71 = arith.constant dense<0.000000e+00> : vector<2x128xf32>
    %159 = tpu.matmul %158, %23, %cst_71 {dimension_numbers = #tpu.dot_dimension_numbers<[1], [0], [0], [1], [0, 0, 1, 1], [], []>} : vector<2x32xf32>, vector<32x128xf32>, vector<2x128xf32> -> vector<2x128xf32>
    %160 = vector.broadcast %24 : vector<1x128xf32> to vector<2x128xf32>
    %161 = arith.addf %159, %160 : vector<2x128xf32>
    %162 = tpu.reduce_index %161 {axis = 1 : i32, kind = #tpu.reduction_kind<arg_max>} : vector<2x128xf32> -> vector<2xi32>
    %163 = arith.index_cast %c1_i32 : i32 to index
    %c0_72 = arith.constant 0 : index
    %c0_73 = arith.constant 0 : index
    %164 = vector.load %arg20[%163, %c0_72, %c0_73] : memref<6x2x128xf32, #tpu.memory_space<vmem>>, vector<1x2x128xf32>
    %165 = vector.shape_cast %164 : vector<1x2x128xf32> to vector<2x128xf32>
    %166 = vector.shape_cast %161 : vector<2x128xf32> to vector<1x2x128xf32>
    tpu.vector_store %arg20[%163, %c0_72, %c0_73], %166 {strides = array<i32>} : memref<6x2x128xf32, #tpu.memory_space<vmem>>, vector<1x2x128xf32>,
    %167 = vector.shape_cast %162 : vector<2xi32> to vector<2x1xi32>
    %c2_i32 = arith.constant 2 : i32
    %168 = vector.broadcast %167 : vector<2x1xi32> to vector<2x24xi32>
    %169 = arith.cmpi eq, %30, %168 : vector<2x24xi32>
    %170 = arith.extui %169 : vector<2x24xi1> to vector<2x24xi32>
    %171 = arith.sitofp %170 : vector<2x24xi32> to vector<2x24xf32>
    %cst_74 = arith.constant dense<0.000000e+00> : vector<2x16xf32>
    %172 = tpu.matmul %171, %14, %cst_74 {dimension_numbers = #tpu.dot_dimension_numbers<[1], [0], [0], [1], [0, 0, 1, 1], [], []>} : vector<2x24xf32>, vector<24x16xf32>, vector<2x16xf32> -> vector<2x16xf32>
    %cst_75 = arith.constant dense<0.000000e+00> : vector<2x8xf32>
    %173 = tpu.matmul %172, %15, %cst_75 {dimension_numbers = #tpu.dot_dimension_numbers<[1], [0], [0], [1], [0, 0, 1, 1], [], []>} : vector<2x16xf32>, vector<16x8xf32>, vector<2x8xf32> -> vector<2x8xf32>
    %174 = arith.addf %29, %173 : vector<2x8xf32>
    %cst_76 = arith.constant dense<0xFF800000> : vector<2xf32>
    %175 = vector.multi_reduction <maximumf>, %174, %cst_76 [1] : vector<2x8xf32> to vector<2xf32>
    %176 = vector.shape_cast %175 : vector<2xf32> to vector<2x1xf32>
    %177 = vector.broadcast %176 : vector<2x1xf32> to vector<2x8xf32>
    %178 = arith.subf %174, %177 : vector<2x8xf32>
    %179 = math.exp %178 : vector<2x8xf32>
    %cst_77 = arith.constant dense<0.000000e+00> : vector<2xf32>
    %180 = vector.multi_reduction <add>, %179, %cst_77 [1] : vector<2x8xf32> to vector<2xf32>
    %181 = vector.shape_cast %180 : vector<2xf32> to vector<2x1xf32>
    %182 = vector.broadcast %181 : vector<2x1xf32> to vector<2x8xf32>
    %183 = arith.divf %179, %182 : vector<2x8xf32>
    %184 = vector.shape_cast %183 : vector<2x8xf32> to vector<2x8x1xf32>
    %185 = vector.broadcast %184 : vector<2x8x1xf32> to vector<2x8x32xf32>
    %186 = arith.mulf %185, %13 : vector<2x8x32xf32>
    %cst_78 = arith.constant dense<0.000000e+00> : vector<2x32xf32>
    %187 = vector.multi_reduction <add>, %186, %cst_78 [1] : vector<2x8x32xf32> to vector<2x32xf32>
    %cst_79 = arith.constant dense<0.000000e+00> : vector<2x16xf32>
    %188 = tpu.matmul %172, %16, %cst_79 {dimension_numbers = #tpu.dot_dimension_numbers<[1], [0], [0], [1], [0, 0, 1, 1], [], []>} : vector<2x16xf32>, vector<16x16xf32>, vector<2x16xf32> -> vector<2x16xf32>
    %cst_80 = arith.constant dense<0.000000e+00> : vector<2x16xf32>
    %189 = tpu.matmul %187, %17, %cst_80 {dimension_numbers = #tpu.dot_dimension_numbers<[1], [0], [0], [1], [0, 0, 1, 1], [], []>} : vector<2x32xf32>, vector<32x16xf32>, vector<2x16xf32> -> vector<2x16xf32>
    %190 = arith.addf %188, %189 : vector<2x16xf32>
    %191 = vector.broadcast %18 : vector<1x16xf32> to vector<2x16xf32>
    %192 = arith.addf %190, %191 : vector<2x16xf32>
    %cst_81 = arith.constant 0.000000e+00 : f32
    %193 = vector.broadcast %cst_81 : f32 to vector<2x16xf32>
    %194 = arith.maximumf %192, %193 : vector<2x16xf32>
    %cst_82 = arith.constant dense<0.000000e+00> : vector<2x96xf32>
    %195 = tpu.matmul %194, %19, %cst_82 {dimension_numbers = #tpu.dot_dimension_numbers<[1], [0], [0], [1], [0, 0, 1, 1], [], []>} : vector<2x16xf32>, vector<16x96xf32>, vector<2x96xf32> -> vector<2x96xf32>
    %196 = vector.broadcast %21 : vector<1x96xf32> to vector<2x96xf32>
    %197 = arith.addf %195, %196 : vector<2x96xf32>
    %cst_83 = arith.constant dense<0.000000e+00> : vector<2x96xf32>
    %198 = tpu.matmul %158, %20, %cst_83 {dimension_numbers = #tpu.dot_dimension_numbers<[1], [0], [0], [1], [0, 0, 1, 1], [], []>} : vector<2x32xf32>, vector<32x96xf32>, vector<2x96xf32> -> vector<2x96xf32>
    %199 = vector.broadcast %22 : vector<1x96xf32> to vector<2x96xf32>
    %200 = arith.addf %198, %199 : vector<2x96xf32>
    %201 = vector.extract_strided_slice %197 {offsets = [0, 0], sizes = [2, 32], strides = [1, 1]} : vector<2x96xf32> to vector<2x32xf32>
    %202 = vector.extract_strided_slice %200 {offsets = [0, 0], sizes = [2, 32], strides = [1, 1]} : vector<2x96xf32> to vector<2x32xf32>
    %203 = arith.addf %201, %202 : vector<2x32xf32>
    %204 = arith.negf %203 : vector<2x32xf32>
    %205 = math.exp %204 : vector<2x32xf32>
    %cst_84 = arith.constant 1.000000e+00 : f32
    %206 = vector.broadcast %cst_84 : f32 to vector<2x32xf32>
    %207 = arith.addf %206, %205 : vector<2x32xf32>
    %208 = arith.divf %206, %207 : vector<2x32xf32>
    %209 = vector.extract_strided_slice %197 {offsets = [0, 32], sizes = [2, 32], strides = [1, 1]} : vector<2x96xf32> to vector<2x32xf32>
    %210 = vector.extract_strided_slice %200 {offsets = [0, 32], sizes = [2, 32], strides = [1, 1]} : vector<2x96xf32> to vector<2x32xf32>
    %211 = arith.addf %209, %210 : vector<2x32xf32>
    %212 = arith.negf %211 : vector<2x32xf32>
    %213 = math.exp %212 : vector<2x32xf32>
    %cst_85 = arith.constant 1.000000e+00 : f32
    %214 = vector.broadcast %cst_85 : f32 to vector<2x32xf32>
    %215 = arith.addf %214, %213 : vector<2x32xf32>
    %216 = arith.divf %214, %215 : vector<2x32xf32>
    %217 = vector.extract_strided_slice %197 {offsets = [0, 64], sizes = [2, 32], strides = [1, 1]} : vector<2x96xf32> to vector<2x32xf32>
    %218 = vector.extract_strided_slice %200 {offsets = [0, 64], sizes = [2, 32], strides = [1, 1]} : vector<2x96xf32> to vector<2x32xf32>
    %219 = arith.mulf %208, %218 : vector<2x32xf32>
    %220 = arith.addf %217, %219 : vector<2x32xf32>
    %221 = math.tanh %220 : vector<2x32xf32>
    %cst_86 = arith.constant 1.000000e+00 : f32
    %222 = vector.broadcast %cst_86 : f32 to vector<2x32xf32>
    %223 = arith.subf %222, %216 : vector<2x32xf32>
    %224 = arith.mulf %223, %221 : vector<2x32xf32>
    %225 = arith.mulf %216, %158 : vector<2x32xf32>
    %226 = arith.addf %224, %225 : vector<2x32xf32>
    %cst_87 = arith.constant dense<0.000000e+00> : vector<2x128xf32>
    %227 = tpu.matmul %226, %23, %cst_87 {dimension_numbers = #tpu.dot_dimension_numbers<[1], [0], [0], [1], [0, 0, 1, 1], [], []>} : vector<2x32xf32>, vector<32x128xf32>, vector<2x128xf32> -> vector<2x128xf32>
    %228 = vector.broadcast %24 : vector<1x128xf32> to vector<2x128xf32>
    %229 = arith.addf %227, %228 : vector<2x128xf32>
    %230 = tpu.reduce_index %229 {axis = 1 : i32, kind = #tpu.reduction_kind<arg_max>} : vector<2x128xf32> -> vector<2xi32>
    %231 = arith.index_cast %c2_i32 : i32 to index
    %c0_88 = arith.constant 0 : index
    %c0_89 = arith.constant 0 : index
    %232 = vector.load %arg20[%231, %c0_88, %c0_89] : memref<6x2x128xf32, #tpu.memory_space<vmem>>, vector<1x2x128xf32>
    %233 = vector.shape_cast %232 : vector<1x2x128xf32> to vector<2x128xf32>
    %234 = vector.shape_cast %229 : vector<2x128xf32> to vector<1x2x128xf32>
    tpu.vector_store %arg20[%231, %c0_88, %c0_89], %234 {strides = array<i32>} : memref<6x2x128xf32, #tpu.memory_space<vmem>>, vector<1x2x128xf32>,
    %235 = vector.shape_cast %230 : vector<2xi32> to vector<2x1xi32>
    %c3_i32 = arith.constant 3 : i32
    %236 = vector.broadcast %235 : vector<2x1xi32> to vector<2x24xi32>
    %237 = arith.cmpi eq, %30, %236 : vector<2x24xi32>
    %238 = arith.extui %237 : vector<2x24xi1> to vector<2x24xi32>
    %239 = arith.sitofp %238 : vector<2x24xi32> to vector<2x24xf32>
    %cst_90 = arith.constant dense<0.000000e+00> : vector<2x16xf32>
    %240 = tpu.matmul %239, %14, %cst_90 {dimension_numbers = #tpu.dot_dimension_numbers<[1], [0], [0], [1], [0, 0, 1, 1], [], []>} : vector<2x24xf32>, vector<24x16xf32>, vector<2x16xf32> -> vector<2x16xf32>
    %cst_91 = arith.constant dense<0.000000e+00> : vector<2x8xf32>
    %241 = tpu.matmul %240, %15, %cst_91 {dimension_numbers = #tpu.dot_dimension_numbers<[1], [0], [0], [1], [0, 0, 1, 1], [], []>} : vector<2x16xf32>, vector<16x8xf32>, vector<2x8xf32> -> vector<2x8xf32>
    %242 = arith.addf %29, %241 : vector<2x8xf32>
    %cst_92 = arith.constant dense<0xFF800000> : vector<2xf32>
    %243 = vector.multi_reduction <maximumf>, %242, %cst_92 [1] : vector<2x8xf32> to vector<2xf32>
    %244 = vector.shape_cast %243 : vector<2xf32> to vector<2x1xf32>
    %245 = vector.broadcast %244 : vector<2x1xf32> to vector<2x8xf32>
    %246 = arith.subf %242, %245 : vector<2x8xf32>
    %247 = math.exp %246 : vector<2x8xf32>
    %cst_93 = arith.constant dense<0.000000e+00> : vector<2xf32>
    %248 = vector.multi_reduction <add>, %247, %cst_93 [1] : vector<2x8xf32> to vector<2xf32>
    %249 = vector.shape_cast %248 : vector<2xf32> to vector<2x1xf32>
    %250 = vector.broadcast %249 : vector<2x1xf32> to vector<2x8xf32>
    %251 = arith.divf %247, %250 : vector<2x8xf32>
    %252 = vector.shape_cast %251 : vector<2x8xf32> to vector<2x8x1xf32>
    %253 = vector.broadcast %252 : vector<2x8x1xf32> to vector<2x8x32xf32>
    %254 = arith.mulf %253, %13 : vector<2x8x32xf32>
    %cst_94 = arith.constant dense<0.000000e+00> : vector<2x32xf32>
    %255 = vector.multi_reduction <add>, %254, %cst_94 [1] : vector<2x8x32xf32> to vector<2x32xf32>
    %cst_95 = arith.constant dense<0.000000e+00> : vector<2x16xf32>
    %256 = tpu.matmul %240, %16, %cst_95 {dimension_numbers = #tpu.dot_dimension_numbers<[1], [0], [0], [1], [0, 0, 1, 1], [], []>} : vector<2x16xf32>, vector<16x16xf32>, vector<2x16xf32> -> vector<2x16xf32>
    %cst_96 = arith.constant dense<0.000000e+00> : vector<2x16xf32>
    %257 = tpu.matmul %255, %17, %cst_96 {dimension_numbers = #tpu.dot_dimension_numbers<[1], [0], [0], [1], [0, 0, 1, 1], [], []>} : vector<2x32xf32>, vector<32x16xf32>, vector<2x16xf32> -> vector<2x16xf32>
    %258 = arith.addf %256, %257 : vector<2x16xf32>
    %259 = vector.broadcast %18 : vector<1x16xf32> to vector<2x16xf32>
    %260 = arith.addf %258, %259 : vector<2x16xf32>
    %cst_97 = arith.constant 0.000000e+00 : f32
    %261 = vector.broadcast %cst_97 : f32 to vector<2x16xf32>
    %262 = arith.maximumf %260, %261 : vector<2x16xf32>
    %cst_98 = arith.constant dense<0.000000e+00> : vector<2x96xf32>
    %263 = tpu.matmul %262, %19, %cst_98 {dimension_numbers = #tpu.dot_dimension_numbers<[1], [0], [0], [1], [0, 0, 1, 1], [], []>} : vector<2x16xf32>, vector<16x96xf32>, vector<2x96xf32> -> vector<2x96xf32>
    %264 = vector.broadcast %21 : vector<1x96xf32> to vector<2x96xf32>
    %265 = arith.addf %263, %264 : vector<2x96xf32>
    %cst_99 = arith.constant dense<0.000000e+00> : vector<2x96xf32>
    %266 = tpu.matmul %226, %20, %cst_99 {dimension_numbers = #tpu.dot_dimension_numbers<[1], [0], [0], [1], [0, 0, 1, 1], [], []>} : vector<2x32xf32>, vector<32x96xf32>, vector<2x96xf32> -> vector<2x96xf32>
    %267 = vector.broadcast %22 : vector<1x96xf32> to vector<2x96xf32>
    %268 = arith.addf %266, %267 : vector<2x96xf32>
    %269 = vector.extract_strided_slice %265 {offsets = [0, 0], sizes = [2, 32], strides = [1, 1]} : vector<2x96xf32> to vector<2x32xf32>
    %270 = vector.extract_strided_slice %268 {offsets = [0, 0], sizes = [2, 32], strides = [1, 1]} : vector<2x96xf32> to vector<2x32xf32>
    %271 = arith.addf %269, %270 : vector<2x32xf32>
    %272 = arith.negf %271 : vector<2x32xf32>
    %273 = math.exp %272 : vector<2x32xf32>
    %cst_100 = arith.constant 1.000000e+00 : f32
    %274 = vector.broadcast %cst_100 : f32 to vector<2x32xf32>
    %275 = arith.addf %274, %273 : vector<2x32xf32>
    %276 = arith.divf %274, %275 : vector<2x32xf32>
    %277 = vector.extract_strided_slice %265 {offsets = [0, 32], sizes = [2, 32], strides = [1, 1]} : vector<2x96xf32> to vector<2x32xf32>
    %278 = vector.extract_strided_slice %268 {offsets = [0, 32], sizes = [2, 32], strides = [1, 1]} : vector<2x96xf32> to vector<2x32xf32>
    %279 = arith.addf %277, %278 : vector<2x32xf32>
    %280 = arith.negf %279 : vector<2x32xf32>
    %281 = math.exp %280 : vector<2x32xf32>
    %cst_101 = arith.constant 1.000000e+00 : f32
    %282 = vector.broadcast %cst_101 : f32 to vector<2x32xf32>
    %283 = arith.addf %282, %281 : vector<2x32xf32>
    %284 = arith.divf %282, %283 : vector<2x32xf32>
    %285 = vector.extract_strided_slice %265 {offsets = [0, 64], sizes = [2, 32], strides = [1, 1]} : vector<2x96xf32> to vector<2x32xf32>
    %286 = vector.extract_strided_slice %268 {offsets = [0, 64], sizes = [2, 32], strides = [1, 1]} : vector<2x96xf32> to vector<2x32xf32>
    %287 = arith.mulf %276, %286 : vector<2x32xf32>
    %288 = arith.addf %285, %287 : vector<2x32xf32>
    %289 = math.tanh %288 : vector<2x32xf32>
    %cst_102 = arith.constant 1.000000e+00 : f32
    %290 = vector.broadcast %cst_102 : f32 to vector<2x32xf32>
    %291 = arith.subf %290, %284 : vector<2x32xf32>
    %292 = arith.mulf %291, %289 : vector<2x32xf32>
    %293 = arith.mulf %284, %226 : vector<2x32xf32>
    %294 = arith.addf %292, %293 : vector<2x32xf32>
    %cst_103 = arith.constant dense<0.000000e+00> : vector<2x128xf32>
    %295 = tpu.matmul %294, %23, %cst_103 {dimension_numbers = #tpu.dot_dimension_numbers<[1], [0], [0], [1], [0, 0, 1, 1], [], []>} : vector<2x32xf32>, vector<32x128xf32>, vector<2x128xf32> -> vector<2x128xf32>
    %296 = vector.broadcast %24 : vector<1x128xf32> to vector<2x128xf32>
    %297 = arith.addf %295, %296 : vector<2x128xf32>
    %298 = tpu.reduce_index %297 {axis = 1 : i32, kind = #tpu.reduction_kind<arg_max>} : vector<2x128xf32> -> vector<2xi32>
    %299 = arith.index_cast %c3_i32 : i32 to index
    %c0_104 = arith.constant 0 : index
    %c0_105 = arith.constant 0 : index
    %300 = vector.load %arg20[%299, %c0_104, %c0_105] : memref<6x2x128xf32, #tpu.memory_space<vmem>>, vector<1x2x128xf32>
    %301 = vector.shape_cast %300 : vector<1x2x128xf32> to vector<2x128xf32>
    %302 = vector.shape_cast %297 : vector<2x128xf32> to vector<1x2x128xf32>
    tpu.vector_store %arg20[%299, %c0_104, %c0_105], %302 {strides = array<i32>} : memref<6x2x128xf32, #tpu.memory_space<vmem>>, vector<1x2x128xf32>,
    %303 = vector.shape_cast %298 : vector<2xi32> to vector<2x1xi32>
    %c4_i32 = arith.constant 4 : i32
    %304 = vector.broadcast %303 : vector<2x1xi32> to vector<2x24xi32>
    %305 = arith.cmpi eq, %30, %304 : vector<2x24xi32>
    %306 = arith.extui %305 : vector<2x24xi1> to vector<2x24xi32>
    %307 = arith.sitofp %306 : vector<2x24xi32> to vector<2x24xf32>
    %cst_106 = arith.constant dense<0.000000e+00> : vector<2x16xf32>
    %308 = tpu.matmul %307, %14, %cst_106 {dimension_numbers = #tpu.dot_dimension_numbers<[1], [0], [0], [1], [0, 0, 1, 1], [], []>} : vector<2x24xf32>, vector<24x16xf32>, vector<2x16xf32> -> vector<2x16xf32>
    %cst_107 = arith.constant dense<0.000000e+00> : vector<2x8xf32>
    %309 = tpu.matmul %308, %15, %cst_107 {dimension_numbers = #tpu.dot_dimension_numbers<[1], [0], [0], [1], [0, 0, 1, 1], [], []>} : vector<2x16xf32>, vector<16x8xf32>, vector<2x8xf32> -> vector<2x8xf32>
    %310 = arith.addf %29, %309 : vector<2x8xf32>
    %cst_108 = arith.constant dense<0xFF800000> : vector<2xf32>
    %311 = vector.multi_reduction <maximumf>, %310, %cst_108 [1] : vector<2x8xf32> to vector<2xf32>
    %312 = vector.shape_cast %311 : vector<2xf32> to vector<2x1xf32>
    %313 = vector.broadcast %312 : vector<2x1xf32> to vector<2x8xf32>
    %314 = arith.subf %310, %313 : vector<2x8xf32>
    %315 = math.exp %314 : vector<2x8xf32>
    %cst_109 = arith.constant dense<0.000000e+00> : vector<2xf32>
    %316 = vector.multi_reduction <add>, %315, %cst_109 [1] : vector<2x8xf32> to vector<2xf32>
    %317 = vector.shape_cast %316 : vector<2xf32> to vector<2x1xf32>
    %318 = vector.broadcast %317 : vector<2x1xf32> to vector<2x8xf32>
    %319 = arith.divf %315, %318 : vector<2x8xf32>
    %320 = vector.shape_cast %319 : vector<2x8xf32> to vector<2x8x1xf32>
    %321 = vector.broadcast %320 : vector<2x8x1xf32> to vector<2x8x32xf32>
    %322 = arith.mulf %321, %13 : vector<2x8x32xf32>
    %cst_110 = arith.constant dense<0.000000e+00> : vector<2x32xf32>
    %323 = vector.multi_reduction <add>, %322, %cst_110 [1] : vector<2x8x32xf32> to vector<2x32xf32>
    %cst_111 = arith.constant dense<0.000000e+00> : vector<2x16xf32>
    %324 = tpu.matmul %308, %16, %cst_111 {dimension_numbers = #tpu.dot_dimension_numbers<[1], [0], [0], [1], [0, 0, 1, 1], [], []>} : vector<2x16xf32>, vector<16x16xf32>, vector<2x16xf32> -> vector<2x16xf32>
    %cst_112 = arith.constant dense<0.000000e+00> : vector<2x16xf32>
    %325 = tpu.matmul %323, %17, %cst_112 {dimension_numbers = #tpu.dot_dimension_numbers<[1], [0], [0], [1], [0, 0, 1, 1], [], []>} : vector<2x32xf32>, vector<32x16xf32>, vector<2x16xf32> -> vector<2x16xf32>
    %326 = arith.addf %324, %325 : vector<2x16xf32>
    %327 = vector.broadcast %18 : vector<1x16xf32> to vector<2x16xf32>
    %328 = arith.addf %326, %327 : vector<2x16xf32>
    %cst_113 = arith.constant 0.000000e+00 : f32
    %329 = vector.broadcast %cst_113 : f32 to vector<2x16xf32>
    %330 = arith.maximumf %328, %329 : vector<2x16xf32>
    %cst_114 = arith.constant dense<0.000000e+00> : vector<2x96xf32>
    %331 = tpu.matmul %330, %19, %cst_114 {dimension_numbers = #tpu.dot_dimension_numbers<[1], [0], [0], [1], [0, 0, 1, 1], [], []>} : vector<2x16xf32>, vector<16x96xf32>, vector<2x96xf32> -> vector<2x96xf32>
    %332 = vector.broadcast %21 : vector<1x96xf32> to vector<2x96xf32>
    %333 = arith.addf %331, %332 : vector<2x96xf32>
    %cst_115 = arith.constant dense<0.000000e+00> : vector<2x96xf32>
    %334 = tpu.matmul %294, %20, %cst_115 {dimension_numbers = #tpu.dot_dimension_numbers<[1], [0], [0], [1], [0, 0, 1, 1], [], []>} : vector<2x32xf32>, vector<32x96xf32>, vector<2x96xf32> -> vector<2x96xf32>
    %335 = vector.broadcast %22 : vector<1x96xf32> to vector<2x96xf32>
    %336 = arith.addf %334, %335 : vector<2x96xf32>
    %337 = vector.extract_strided_slice %333 {offsets = [0, 0], sizes = [2, 32], strides = [1, 1]} : vector<2x96xf32> to vector<2x32xf32>
    %338 = vector.extract_strided_slice %336 {offsets = [0, 0], sizes = [2, 32], strides = [1, 1]} : vector<2x96xf32> to vector<2x32xf32>
    %339 = arith.addf %337, %338 : vector<2x32xf32>
    %340 = arith.negf %339 : vector<2x32xf32>
    %341 = math.exp %340 : vector<2x32xf32>
    %cst_116 = arith.constant 1.000000e+00 : f32
    %342 = vector.broadcast %cst_116 : f32 to vector<2x32xf32>
    %343 = arith.addf %342, %341 : vector<2x32xf32>
    %344 = arith.divf %342, %343 : vector<2x32xf32>
    %345 = vector.extract_strided_slice %333 {offsets = [0, 32], sizes = [2, 32], strides = [1, 1]} : vector<2x96xf32> to vector<2x32xf32>
    %346 = vector.extract_strided_slice %336 {offsets = [0, 32], sizes = [2, 32], strides = [1, 1]} : vector<2x96xf32> to vector<2x32xf32>
    %347 = arith.addf %345, %346 : vector<2x32xf32>
    %348 = arith.negf %347 : vector<2x32xf32>
    %349 = math.exp %348 : vector<2x32xf32>
    %cst_117 = arith.constant 1.000000e+00 : f32
    %350 = vector.broadcast %cst_117 : f32 to vector<2x32xf32>
    %351 = arith.addf %350, %349 : vector<2x32xf32>
    %352 = arith.divf %350, %351 : vector<2x32xf32>
    %353 = vector.extract_strided_slice %333 {offsets = [0, 64], sizes = [2, 32], strides = [1, 1]} : vector<2x96xf32> to vector<2x32xf32>
    %354 = vector.extract_strided_slice %336 {offsets = [0, 64], sizes = [2, 32], strides = [1, 1]} : vector<2x96xf32> to vector<2x32xf32>
    %355 = arith.mulf %344, %354 : vector<2x32xf32>
    %356 = arith.addf %353, %355 : vector<2x32xf32>
    %357 = math.tanh %356 : vector<2x32xf32>
    %cst_118 = arith.constant 1.000000e+00 : f32
    %358 = vector.broadcast %cst_118 : f32 to vector<2x32xf32>
    %359 = arith.subf %358, %352 : vector<2x32xf32>
    %360 = arith.mulf %359, %357 : vector<2x32xf32>
    %361 = arith.mulf %352, %294 : vector<2x32xf32>
    %362 = arith.addf %360, %361 : vector<2x32xf32>
    %cst_119 = arith.constant dense<0.000000e+00> : vector<2x128xf32>
    %363 = tpu.matmul %362, %23, %cst_119 {dimension_numbers = #tpu.dot_dimension_numbers<[1], [0], [0], [1], [0, 0, 1, 1], [], []>} : vector<2x32xf32>, vector<32x128xf32>, vector<2x128xf32> -> vector<2x128xf32>
    %364 = vector.broadcast %24 : vector<1x128xf32> to vector<2x128xf32>
    %365 = arith.addf %363, %364 : vector<2x128xf32>
    %366 = tpu.reduce_index %365 {axis = 1 : i32, kind = #tpu.reduction_kind<arg_max>} : vector<2x128xf32> -> vector<2xi32>
    %367 = arith.index_cast %c4_i32 : i32 to index
    %c0_120 = arith.constant 0 : index
    %c0_121 = arith.constant 0 : index
    %368 = vector.load %arg20[%367, %c0_120, %c0_121] : memref<6x2x128xf32, #tpu.memory_space<vmem>>, vector<1x2x128xf32>
    %369 = vector.shape_cast %368 : vector<1x2x128xf32> to vector<2x128xf32>
    %370 = vector.shape_cast %365 : vector<2x128xf32> to vector<1x2x128xf32>
    tpu.vector_store %arg20[%367, %c0_120, %c0_121], %370 {strides = array<i32>} : memref<6x2x128xf32, #tpu.memory_space<vmem>>, vector<1x2x128xf32>,
    %371 = vector.shape_cast %366 : vector<2xi32> to vector<2x1xi32>
    %c5_i32 = arith.constant 5 : i32
    %372 = vector.broadcast %371 : vector<2x1xi32> to vector<2x24xi32>
    %373 = arith.cmpi eq, %30, %372 : vector<2x24xi32>
    %374 = arith.extui %373 : vector<2x24xi1> to vector<2x24xi32>
    %375 = arith.sitofp %374 : vector<2x24xi32> to vector<2x24xf32>
    %cst_122 = arith.constant dense<0.000000e+00> : vector<2x16xf32>
    %376 = tpu.matmul %375, %14, %cst_122 {dimension_numbers = #tpu.dot_dimension_numbers<[1], [0], [0], [1], [0, 0, 1, 1], [], []>} : vector<2x24xf32>, vector<24x16xf32>, vector<2x16xf32> -> vector<2x16xf32>
    %cst_123 = arith.constant dense<0.000000e+00> : vector<2x8xf32>
    %377 = tpu.matmul %376, %15, %cst_123 {dimension_numbers = #tpu.dot_dimension_numbers<[1], [0], [0], [1], [0, 0, 1, 1], [], []>} : vector<2x16xf32>, vector<16x8xf32>, vector<2x8xf32> -> vector<2x8xf32>
    %378 = arith.addf %29, %377 : vector<2x8xf32>
    %cst_124 = arith.constant dense<0xFF800000> : vector<2xf32>
    %379 = vector.multi_reduction <maximumf>, %378, %cst_124 [1] : vector<2x8xf32> to vector<2xf32>
    %380 = vector.shape_cast %379 : vector<2xf32> to vector<2x1xf32>
    %381 = vector.broadcast %380 : vector<2x1xf32> to vector<2x8xf32>
    %382 = arith.subf %378, %381 : vector<2x8xf32>
    %383 = math.exp %382 : vector<2x8xf32>
    %cst_125 = arith.constant dense<0.000000e+00> : vector<2xf32>
    %384 = vector.multi_reduction <add>, %383, %cst_125 [1] : vector<2x8xf32> to vector<2xf32>
    %385 = vector.shape_cast %384 : vector<2xf32> to vector<2x1xf32>
    %386 = vector.broadcast %385 : vector<2x1xf32> to vector<2x8xf32>
    %387 = arith.divf %383, %386 : vector<2x8xf32>
    %388 = vector.shape_cast %387 : vector<2x8xf32> to vector<2x8x1xf32>
    %389 = vector.broadcast %388 : vector<2x8x1xf32> to vector<2x8x32xf32>
    %390 = arith.mulf %389, %13 : vector<2x8x32xf32>
    %cst_126 = arith.constant dense<0.000000e+00> : vector<2x32xf32>
    %391 = vector.multi_reduction <add>, %390, %cst_126 [1] : vector<2x8x32xf32> to vector<2x32xf32>
    %cst_127 = arith.constant dense<0.000000e+00> : vector<2x16xf32>
    %392 = tpu.matmul %376, %16, %cst_127 {dimension_numbers = #tpu.dot_dimension_numbers<[1], [0], [0], [1], [0, 0, 1, 1], [], []>} : vector<2x16xf32>, vector<16x16xf32>, vector<2x16xf32> -> vector<2x16xf32>
    %cst_128 = arith.constant dense<0.000000e+00> : vector<2x16xf32>
    %393 = tpu.matmul %391, %17, %cst_128 {dimension_numbers = #tpu.dot_dimension_numbers<[1], [0], [0], [1], [0, 0, 1, 1], [], []>} : vector<2x32xf32>, vector<32x16xf32>, vector<2x16xf32> -> vector<2x16xf32>
    %394 = arith.addf %392, %393 : vector<2x16xf32>
    %395 = vector.broadcast %18 : vector<1x16xf32> to vector<2x16xf32>
    %396 = arith.addf %394, %395 : vector<2x16xf32>
    %cst_129 = arith.constant 0.000000e+00 : f32
    %397 = vector.broadcast %cst_129 : f32 to vector<2x16xf32>
    %398 = arith.maximumf %396, %397 : vector<2x16xf32>
    %cst_130 = arith.constant dense<0.000000e+00> : vector<2x96xf32>
    %399 = tpu.matmul %398, %19, %cst_130 {dimension_numbers = #tpu.dot_dimension_numbers<[1], [0], [0], [1], [0, 0, 1, 1], [], []>} : vector<2x16xf32>, vector<16x96xf32>, vector<2x96xf32> -> vector<2x96xf32>
    %400 = vector.broadcast %21 : vector<1x96xf32> to vector<2x96xf32>
    %401 = arith.addf %399, %400 : vector<2x96xf32>
    %cst_131 = arith.constant dense<0.000000e+00> : vector<2x96xf32>
    %402 = tpu.matmul %362, %20, %cst_131 {dimension_numbers = #tpu.dot_dimension_numbers<[1], [0], [0], [1], [0, 0, 1, 1], [], []>} : vector<2x32xf32>, vector<32x96xf32>, vector<2x96xf32> -> vector<2x96xf32>
    %403 = vector.broadcast %22 : vector<1x96xf32> to vector<2x96xf32>
    %404 = arith.addf %402, %403 : vector<2x96xf32>
    %405 = vector.extract_strided_slice %401 {offsets = [0, 0], sizes = [2, 32], strides = [1, 1]} : vector<2x96xf32> to vector<2x32xf32>
    %406 = vector.extract_strided_slice %404 {offsets = [0, 0], sizes = [2, 32], strides = [1, 1]} : vector<2x96xf32> to vector<2x32xf32>
    %407 = arith.addf %405, %406 : vector<2x32xf32>
    %408 = arith.negf %407 : vector<2x32xf32>
    %409 = math.exp %408 : vector<2x32xf32>
    %cst_132 = arith.constant 1.000000e+00 : f32
    %410 = vector.broadcast %cst_132 : f32 to vector<2x32xf32>
    %411 = arith.addf %410, %409 : vector<2x32xf32>
    %412 = arith.divf %410, %411 : vector<2x32xf32>
    %413 = vector.extract_strided_slice %401 {offsets = [0, 32], sizes = [2, 32], strides = [1, 1]} : vector<2x96xf32> to vector<2x32xf32>
    %414 = vector.extract_strided_slice %404 {offsets = [0, 32], sizes = [2, 32], strides = [1, 1]} : vector<2x96xf32> to vector<2x32xf32>
    %415 = arith.addf %413, %414 : vector<2x32xf32>
    %416 = arith.negf %415 : vector<2x32xf32>
    %417 = math.exp %416 : vector<2x32xf32>
    %cst_133 = arith.constant 1.000000e+00 : f32
    %418 = vector.broadcast %cst_133 : f32 to vector<2x32xf32>
    %419 = arith.addf %418, %417 : vector<2x32xf32>
    %420 = arith.divf %418, %419 : vector<2x32xf32>
    %421 = vector.extract_strided_slice %401 {offsets = [0, 64], sizes = [2, 32], strides = [1, 1]} : vector<2x96xf32> to vector<2x32xf32>
    %422 = vector.extract_strided_slice %404 {offsets = [0, 64], sizes = [2, 32], strides = [1, 1]} : vector<2x96xf32> to vector<2x32xf32>
    %423 = arith.mulf %412, %422 : vector<2x32xf32>
    %424 = arith.addf %421, %423 : vector<2x32xf32>
    %425 = math.tanh %424 : vector<2x32xf32>
    %cst_134 = arith.constant 1.000000e+00 : f32
    %426 = vector.broadcast %cst_134 : f32 to vector<2x32xf32>
    %427 = arith.subf %426, %420 : vector<2x32xf32>
    %428 = arith.mulf %427, %425 : vector<2x32xf32>
    %429 = arith.mulf %420, %362 : vector<2x32xf32>
    %430 = arith.addf %428, %429 : vector<2x32xf32>
    %cst_135 = arith.constant dense<0.000000e+00> : vector<2x128xf32>
    %431 = tpu.matmul %430, %23, %cst_135 {dimension_numbers = #tpu.dot_dimension_numbers<[1], [0], [0], [1], [0, 0, 1, 1], [], []>} : vector<2x32xf32>, vector<32x128xf32>, vector<2x128xf32> -> vector<2x128xf32>
    %432 = vector.broadcast %24 : vector<1x128xf32> to vector<2x128xf32>
    %433 = arith.addf %431, %432 : vector<2x128xf32>
    %434 = tpu.reduce_index %433 {axis = 1 : i32, kind = #tpu.reduction_kind<arg_max>} : vector<2x128xf32> -> vector<2xi32>
    %435 = arith.index_cast %c5_i32 : i32 to index
    %c0_136 = arith.constant 0 : index
    %c0_137 = arith.constant 0 : index
    %436 = vector.load %arg20[%435, %c0_136, %c0_137] : memref<6x2x128xf32, #tpu.memory_space<vmem>>, vector<1x2x128xf32>
    %437 = vector.shape_cast %436 : vector<1x2x128xf32> to vector<2x128xf32>
    %438 = vector.shape_cast %433 : vector<2x128xf32> to vector<1x2x128xf32>
    tpu.vector_store %arg20[%435, %c0_136, %c0_137], %438 {strides = array<i32>} : memref<6x2x128xf32, #tpu.memory_space<vmem>>, vector<1x2x128xf32>,
    %439 = vector.shape_cast %434 : vector<2xi32> to vector<2x1xi32>
    %c6_i32 = arith.constant 6 : i32
    %c0_138 = arith.constant 0 : index
    %c0_139 = arith.constant 0 : index
    %440 = vector.load %arg21[%c0_138, %c0_139] : memref<2x32xf32, #tpu.memory_space<vmem>>, vector<2x32xf32>
    tpu.vector_store %arg21[%c0_138, %c0_139], %430 {strides = array<i32>} : memref<2x32xf32, #tpu.memory_space<vmem>>, vector<2x32xf32>,
    return
  }
}

</mosaic_0001>

<bundles_post_ra>
// kernel: tpu_custom_call.1
= control target key start
LH: loop header
LB: loop body
LE: loop exit
PB: predicated region body
PF: predicated region fallthrough
CT: control target
= control target key end

     0   :  { %s5781_s0 = inlined_call_operand.vmem [shape: f32[2,8,64], index: 0, kind: input, shape index: {}]   ;;  %s5782_s1 = inlined_call_operand.vmem [shape: f32[2,64], index: 1, kind: input, shape index: {}]   ;;  %s5783_s2 = inlined_call_operand.vmem [shape: s32[2,1], index: 2, kind: input, shape index: {}]   ;;  %s5784_s3 = inlined_call_operand.vmem [shape: f32[64,32], index: 3, kind: input, shape index: {}]   ;;  %s5785_s4 = inlined_call_operand.vmem [shape: f32[1,32], index: 4, kind: input, shape index: {}]   ;;  %s5786_s5 = inlined_call_operand.vmem [shape: f32[64,32], index: 5, kind: input, shape index: {}]   ;;  %s5787_s6 = inlined_call_operand.vmem [shape: f32[1,32], index: 6, kind: input, shape index: {}]   ;;  %s5788_s7 = inlined_call_operand.vmem [shape: f32[24,16], index: 7, kind: input, shape index: {}]   ;;  %s5789_s8 = inlined_call_operand.vmem [shape: f32[32,8], index: 8, kind: input, shape index: {}]   ;;  %s5790_s9 = inlined_call_operand.vmem [shape: f32[16,8], index: 9, kind: input, shape index: {}]   ;;  %s5791_s10 = inlined_call_operand.vmem [shape: f32[1,8], index: 10, kind: input, shape index: {}]   ;;  %s5792_s11 = inlined_call_operand.vmem [shape: f32[16,16], index: 11, kind: input, shape index: {}]   ;;  %s5793_s12 = inlined_call_operand.vmem [shape: f32[32,16], index: 12, kind: input, shape index: {}]   ;;  %s5794_s13 = inlined_call_operand.vmem [shape: f32[1,16], index: 13, kind: input, shape index: {}]   ;;  %s5795_s14 = inlined_call_operand.vmem [shape: f32[16,96], index: 14, kind: input, shape index: {}]   ;;  %s5796_s15 = inlined_call_operand.vmem [shape: f32[32,96], index: 15, kind: input, shape index: {}]   ;;  %s5797_s16 = inlined_call_operand.vmem [shape: f32[1,96], index: 16, kind: input, shape index: {}]   ;;  %s5798_s17 = inlined_call_operand.vmem [shape: f32[1,96], index: 17, kind: input, shape index: {}]   ;;  %s5799_s18 = inlined_call_operand.vmem [shape: f32[32,128], index: 18, kind: input, shape index: {}]   ;;  %s5800_s19 = inlined_call_operand.vmem [shape: f32[1,128], index: 19, kind: input, shape index: {}]   ;;  %s5801_s20 = inlined_call_operand.hbm [shape: f32[6,2,128], index: 20, kind: output, shape index: {0}]   ;;  %s5802_s21 = inlined_call_operand.hbm [shape: f32[2,32], index: 21, kind: output, shape index: {1}]  }
   0x1   :  { %5806 = sst [smem:[#allocation8_spill]] %s5781_s0 }
   0x2   :  { %5807 = sst [smem:[#allocation9_spill]] %s5782_s1 }
   0x3   :  { %5808 = sst [smem:[#allocation10_spill]] %s5783_s2 }
   0x4   :  { %5809 = sst [smem:[#allocation11_spill]] %s5784_s3 }
   0x5   :  { %5810 = sst [smem:[#allocation12_spill]] %s5785_s4 }
   0x6   :  { %5811 = sst [smem:[#allocation13_spill]] %s5786_s5 }
   0x7   :  { %27 = vsyncpa [#allocation3], 0  ;;  %s5812_s26 = sld [smem:[#allocation10_spill]]  ;;  %s5813_s28 = sld [smem:[#allocation13_spill]]  ;;  %v4978_v3 = vmov 0   ;;  %v4979_v5 = vmov 0.0|0.0  }
   0x8   :  { %4864 = vset.pattern.permute.xlu0 %v4978_v3  ;;  %4640 = vmatprep.subr.bf16.mxu0 %v4979_v5  ;;  %s5814_s5 = sld [smem:[#allocation11_spill]]  ;;  %vm4980_vm0 = vmmov 0   ;;  %v4981_v13 = vmov 0.0   ;;  %vm85_vm1 = vcmask 523264   ;;  %s5815_s27 = sld [smem:[#allocation8_spill]] }
   0x9   :  { %4229 = vmatprep.mubr.msk.f32.mxu0 %vm4980_vm0, %v4981_v13 }
   0xd   :  { %v369_v0 = vld [vmem:[%s5812_s26] sm:$0x3]  ;;  %v162_v2 = vld [vmem:[%s5813_s28 + $0x8] sm:$0xff]  ;;  %v163_v8 = vld [vmem:[%s5813_s28 + $0x10] sm:$0xff] }
   0xe   :  { %v161_v1 = vld [vmem:[%s5813_s28] sm:$0xff]  ;;  %v71_v7 = vld [vmem:[%s5814_s5 + $0x8] sm:$0xff]  ;;  %371 = vperm.xlu0 %4864, %v369_v0   ;;  %v164_v10 = vld [vmem:[%s5813_s28 + $0x18] sm:$0xff] }
   0xf   :  { %v4652_v4 = vpack.c.bf16 %v162_v2, %v161_v1  ;;  %v70_v6 = vld [vmem:[%s5814_s5] sm:$0xff]  ;;  %v72_v11 = vld [vmem:[%s5814_s5 + $0x10] sm:$0xff]  ;;  %v73_v12 = vld [vmem:[%s5814_s5 + $0x18] sm:$0xff]  ;;  %v4656_v14 = vpack.c.bf16 %v164_v10, %v163_v8 }
  0x10   :  { %v4641_v9 = vpack.c.bf16 %v71_v7, %v70_v6  ;;  %v165_v15 = vld [vmem:[%s5813_s28 + $0x20] sm:$0xff]  ;;  %v166_v16 = vld [vmem:[%s5813_s28 + $0x28] sm:$0xff]  ;;  %v4644_v17 = vpack.c.bf16 %v73_v12, %v72_v11  ;;  %v167_v22 = vld [vmem:[%s5813_s28 + $0x30] sm:$0xff] }
  0x11   :  { %4653 = vmatprep.subr.bf16.mxu1 %v4652_v4  ;;  %v4660_v18 = vpack.c.bf16 %v166_v16, %v165_v15  ;;  %v74_v19 = vld [vmem:[%s5814_s5 + $0x20] sm:$0xff]  ;;  %v75_v20 = vld [vmem:[%s5814_s5 + $0x28] sm:$0xff]  ;;  %v168_v23 = vld [vmem:[%s5813_s28 + $0x38] sm:$0xff] }
  0x12   :  { %4655 = vmatpush3.bf16.msra.mxu1 %v4652_v4  ;;  %4642 = vmatpush3.bf16.msra.mxu0 %v4641_v9  ;;  %v159_v21 = vld [vmem:[%s5815_s27] sm:$0xff]  ;;  %v4647_v24 = vpack.c.bf16 %v75_v20, %v74_v19 }
  0x13   :  { %4657 = vmatprep.subr.bf16.mxu1 %v4656_v14  ;;  %4643 = vmatprep.subr.bf16.mxu0 %v4979_v5 }
  0x14   :  { %4248 = vmatprep.mubr.msk.f32.mxu1 %vm85_vm1, %v159_v21 }
  0x16   :  { %4659 = vmatpush3.bf16.msra.mxu1 %v4656_v14  ;;  %4645 = vmatpush3.bf16.msra.mxu0 %v4644_v17 }
  0x17   :  { %28 = vsyncpa [#allocation5], 0  ;;  %4661 = vmatprep.subr.bf16.mxu1 %v4660_v18  ;;  %4646 = vmatprep.subr.bf16.mxu0 %v4979_v5  ;;  %v4664_v25 = vpack.c.bf16 %v168_v23, %v167_v22  ;;  %v76_v26 = vld [vmem:[%s5814_s5 + $0x30] sm:$0xff]  ;;  %v77_v27 = vld [vmem:[%s5814_s5 + $0x38] sm:$0xff]  ;;  %s5816_s23 = sld [smem:[#allocation9_spill]]  ;;  %v367_v41 = vlaneseq  ;;  %vm376_vm2 = vcmask 195584  }
  0x18   :  { %v4650_v28 = vpack.c.bf16 %v77_v27, %v76_v26  ;;  %v257_v29 = vld [vmem:[%s5788_s7] sm:$0xff]  ;;  %v258_v30 = vld [vmem:[%s5788_s7 + $0x8] sm:$0xff]  ;;  %v5190_v37 = vld [vmem:[%s5788_s7 + $0x10] sm:$0xff]  ;;  %vm293_vm4 = vcmask 261120   ;;  %vm450_vm5 = vcmask 130048   ;;  %vm525_vm6 = vcmask 58368  }
  0x19   :  { %v282_v31 = vld [vmem:[%s5789_s8] sm:$0xff]  ;;  %v283_v32 = vld [vmem:[%s5789_s8 + $0x8] sm:$0xff]  ;;  %v5174_v34 = vpack.c.bf16 %v258_v30, %v257_v29  ;;  %v284_v38 = vld [vmem:[%s5789_s8 + $0x10] sm:$0xff]  ;;  %v5204_v42 = vand.u32 127, %v367_v41  ;;  %s4982_s1 = smov 32   ;;  %v538_v12 = vshrl.u32 %v367_v41, 7 }
  0x1a   :  { %4663 = vmatpush3.bf16.msra.mxu1 %v4660_v18  ;;  %4648 = vmatpush3.bf16.msra.mxu0 %v4647_v24  ;;  %v160_v33 = vld [vmem:[%s5815_s27 + $0x8] sm:$0xff]  ;;  %v4669_v36 = vpack.c.bf16 %v283_v32, %v282_v31  ;;  %v285_v39 = vld [vmem:[%s5789_s8 + $0x18] sm:$0xff]  ;;  %v260_v43 = vld [vmem:[%s5790_s9] sm:$0xff]  ;;  %vm569_vm7 = vcmask 1041409   ;;  %s4983_s25 = smov 64   ;;  %s4984_s30 = smov 96  }
  0x1b   :  { %4665 = vmatprep.subr.bf16.mxu1 %v4664_v25  ;;  %4649 = vmatprep.subr.bf16.mxu0 %v4979_v5  ;;  %v4672_v40 = vpack.c.bf16 %v285_v39, %v284_v38  ;;  %v261_v44 = vld [vmem:[%s5790_s9 + $0x8] sm:$0xff]  ;;  %s5817_s9 = sld [smem:[#allocation12_spill]]  ;;  %v262_v54 = vld [vmem:[%s5792_s11] sm:$0xff]  ;;  %v5260_v14 = vsub.s32 0, %v538_v12  ;;  %v5271_v21 = vsub.s32 1, %v538_v12  ;;  %v266_v22 = vld [vmem:[%s5793_s12 + $0x10] sm:$0xff] }
  0x1c   :  { %v5212_v46 = vpack.c.bf16 %v261_v44, %v260_v43  ;;  %v263_v55 = vld [vmem:[%s5792_s11 + $0x8] sm:$0xff]  ;;  %v3961_v61 = vld [vmem:[%s5791_s10] ss:$0 sm:$0xff]  ;;  %v267_v23 = vld [vmem:[%s5793_s12 + $0x18] sm:$0xff]  ;;  %vm986_vm8 = vcmask 1041408   ;;  %vm3924_vm14 = vcmask 254976  }
  0x1d   :  { %v69_v35 = vld [vmem:[%s5816_s23] sm:$0x3]  ;;  %v5238_v56 = vpack.c.bf16 %v263_v55, %v262_v54  ;;  %v265_v18 = vld [vmem:[%s5793_s12 + $0x8] sm:$0xff]  ;;  %v5281_v24 = vpack.c.bf16 %v267_v23, %v266_v22  ;;  %v273_v55 = vld [vmem:[%s5796_s15 + $0x10] sm:$0xff] }
  0x1e   :  { %4667 = vmatpush3.bf16.msra.mxu1 %v4664_v25  ;;  %4651 = vmatpush3.bf16.msra.mxu0 %v4650_v28  ;;  %v264_v17 = vld [vmem:[%s5793_s12] sm:$0xff] }
  0x1f   :  { %4674 = vmatprep.subr.bf16.mxu1 %v4979_v5  ;;  %4668 = vmatprep.subr.bf16.mxu0 %v4979_v5  ;;  %v5268_v19 = vpack.c.bf16 %v265_v18, %v264_v17  ;;  %v3958_v26 = vld [vmem:[%s5787_s6] ss:$0 sm:$0xff] }
  0x21   :  { %4249 = vmatmul.mubr.msk.f32.vlgmr.msra.gmra.mrb[0].mxu1 %vm85_vm1, %v160_v33  ;;  %4230 = vmatmul.mubr.msk.f32.vlgmr.msra.gmra.mrb[0].mxu0 %vm85_vm1, %v69_v35  ;;  %v3956_v48 = vld [vmem:[%s5817_s9] ss:$0 sm:$0xff] }
  0x22   :  { %4676 = vmatpush3.bf16.msra.mxu1 %v5174_v34  ;;  %4268 = vmatprep.mubr.msk.f32.mxu1 %vm4980_vm0, %v4981_v13 }
  0x23   :  { %4266 = vmatprep.subr.mxu1 %v4981_v13  ;;  %4670 = vmatpush3.bf16.msra.mxu0 %v4669_v36 }
  0x24   :  { %4671 = vmatprep.subr.bf16.mxu0 %v4979_v5  ;;  %4259 = vmatprep.mubr.msk.f32.mxu0 %vm4980_vm0, %v4981_v13 }
  0x26   :  { %4267 = vmatpush3.msra.mxu1 %v5190_v37 }
  0x27   :  { %4677 = vmatprep.subr.bf16.mxu1 %v4979_v5  ;;  %4673 = vmatpush3.bf16.msra.mxu0 %v4672_v40 }
  0x28   :  { %4680 = vmatprep.subr.bf16.mxu0 %v4979_v5 }
  0x8d   :  { %v372_v45 = vpop.permute.xlu0 %371 }
  0x8e   :  { %vm373_vm3 = vcmp.eq.s32.totalorder %v5204_v42, %v372_v45 }
  0x8f   :  { %v3963_v47 = vsel %vm373_vm3, 1.0, %v4981_v13 }
  0x90   :  { %4269 = vmatmul.mubr.msk.f32.vlgmr.msra.gmra.mrb[2].mxu1 %vm376_vm2, %v3963_v47 }
  0x91   :  { %4679 = vmatpush3.bf16.msra.mxu1 %v5212_v46  ;;  %4275 = vmatprep.mubr.msk.f32.mxu1 %vm4980_vm0, %v4981_v13 }
  0x92   :  { %4686 = vmatprep.subr.bf16.mxu1 %v4979_v5 }
  0xf4   :  { %v5224_v49 = vpop.f32.mrb[0].mxu1  ;;  %v155_v50 = vpop.f32.mrb[0].mxu0 }
  0xf5   :  { %v248_v51 = vpop.f32.mrb[1].mxu1  ;;  %v5226_v52 = vadd.f32 %v3956_v48, %v155_v50  ;;  %v4231_v53 = vpop.f32.mrb[1].mxu0  ;;  %v5293_v30 = vadd.f32 %v5224_v49, %v3958_v26  ;;  %v271_v48 = vld [vmem:[%s5796_s15] sm:$0xff]  ;;  %v272_v49 = vld [vmem:[%s5796_s15 + $0x8] sm:$0xff] }
  0xf6   :  { %v5289_v27 = vadd.f32 %v3958_v26, %v248_v51  ;;  %v5304_v54 = vpack.c.bf16 %v272_v49, %v271_v48  ;;  %v5400_v48 = vld [vmem:[%s5800_s19] ss:$0 sm:$0xff] }
  0xf7   :  { %4260 = vmatmul.mubr.msk.f32.vlgmr.msra.gmra.mrb[2].mxu0 %vm293_vm4, %v5226_v52 }
  0xf8   :  { %4286 = vmatprep.mubr.msk.f32.mxu0 %vm4980_vm0, %v4981_v13  ;;  %4682 = vmatpush3.bf16.msra.mxu0 %v5268_v19 }
  0xf9   :  { %4683 = vmatprep.subr.bf16.mxu0 %v4979_v5 }
  0xfc   :  { %4685 = vmatpush3.bf16.msra.mxu0 %v5281_v24 }
  0xfd   :  { %4692 = vmatprep.subr.bf16.mxu0 %v4979_v5 }
 0x163   :  { %v446_v57 = vpop.f32.mrb[2].mxu1 }
 0x164   :  { %v4270_v58 = vpop.f32.mrb[3].mxu1  ;;  %4276 = vmatmul.mubr.msk.f32.vlgmr.msra.gmra.mrb[4].mxu1 %vm450_vm5, %v446_v57 }
 0x165   :  { %4688 = vmatpush3.bf16.msra.mxu1 %v5238_v56  ;;  %4293 = vmatprep.mubr.msk.f32.mxu1 %vm4980_vm0, %v4981_v13 }
 0x166   :  { %4689 = vmatprep.subr.bf16.mxu1 %v4979_v5 }
 0x168   :  { %4294 = vmatmul.mubr.msk.f32.vlgmr.msra.gmra.mrb[6].mxu1 %vm450_vm5, %v446_v57  ;;  %v274_v57 = vld [vmem:[%s5796_s15 + $0x18] sm:$0xff] }
 0x169   :  { %4300 = vmatprep.mubr.msk.f32.mxu1 %vm4980_vm0, %v4981_v13 }
 0x1ca   :  { %v363_v59 = vpop.f32.mrb[2].mxu0 }
 0x1cb   :  { %v4261_v60 = vpop.f32.mrb[3].mxu0  ;;  %v5251_v62 = vadd.f32 %v3961_v61, %v363_v59  ;;  %v5315_v59 = vpack.c.bf16 %v274_v57, %v273_v55  ;;  %v270_v61 = vld [vmem:[%s5795_s14 + $0x8] sm:$0xff] }
 0x1cc   :  { %v269_v60 = vld [vmem:[%s5795_s14] sm:$0xff] }
 0x237   :  { %v520_v63 = vpop.f32.mrb[4].mxu1 }
 0x238   :  { %v524_v0 = vadd.f32 %v520_v63, %v5251_v62  ;;  %v4277_v1 = vpop.f32.mrb[5].mxu1  ;;  %v5343_v63 = vld [vmem:[%s5794_s13] ss:$0 sm:$0xff] }
 0x23a   :  { %v526_v2 = vsel %vm525_vm6, %v524_v0, -inf }
 0x23b   :  { %v5255_v3 = vpop.f32.mrb[6].mxu1  ;;  %527 = vmax.xlane.f32.xlu0 %v526_v2 }
 0x23c   :  { %v4295_v4 = vpop.f32.mrb[7].mxu1 }
 0x251   :  { %900 = vrot.lane.b32.xlu0 %v5226_v52, %s4982_s1 }
 0x2c8   :  { %v528_v6 = vpop.xlane.xlu0 %527 }
 0x2c9   :  { %v529_v7 = vsub.f32 %v524_v0, %v528_v6 }
 0x2cb   :  { %v530_v8 = vmul.f32 1.442695, %v529_v7  ;;  %v5350_v7 = vld [vmem:[%s5798_s17] ss:$0 sm:$0xff] }
 0x2cd   :  { %4865 = vpow2.f32 %v530_v8 }
 0x2d7   :  { %v4866_v9 = vpop.eup %4865 }
 0x2d8   :  { %v532_v10 = vsel %vm525_vm6, %v4866_v9, 0.0 }
 0x2d9   :  { %533 = vadd.xlane.f32.xlu1 %v532_v10 }
 0x366   :  { %v534_v11 = vpop.xlane.xlu1 %533 }
 0x367   :  { %4867 = vrcp.f32 %v534_v11 }
 0x371   :  { %v4868_v15 = vpop.eup %4867 }
 0x372   :  { %v536_v16 = vmul.f32 %v4868_v15, %v4866_v9 }
 0x374   :  { %v540_v20 = vrot.slane %v536_v16, %v5260_v14  ;;  %v547_v25 = vrot.slane %v536_v16, %v5271_v21 }
 0x376   :  { %542 = vbcast.lane.b32.xlu1 %v540_v20, 256 }
 0x37a   :  { %549 = vbcast.lane.b32.xlu1 %v547_v25, 256 }
 0x3e8   :  { %v543_v28 = vpop.permute.xlu1 %542 }
 0x3e9   :  { %v551_v29 = vmul.f32 %v543_v28, %v5289_v27 }
 0x3eb   :  { %v553_v31 = vsel %vm293_vm4, %v551_v29, 0.0  ;;  %v277_v29 = vld [vmem:[%s5799_s18] sm:$0xff] }
 0x3ec   :  { %v554_v32 = vrot.slane %v553_v31, 4  ;;  %v550_v33 = vpop.permute.xlu1 %549 }
 0x3ed   :  { %v552_v35 = vmul.f32 %v550_v33, %v5293_v30 }
 0x3ee   :  { %v555_v36 = vadd.f32 %v554_v32, %v553_v31  ;;  %v278_v31 = vld [vmem:[%s5799_s18 + $0x8] sm:$0xff]  ;;  %v279_v32 = vld [vmem:[%s5799_s18 + $0x10] sm:$0xff] }
 0x3ef   :  { %v560_v38 = vsel %vm293_vm4, %v552_v35, 0.0  ;;  %v5373_v33 = vpack.c.bf16 %v278_v31, %v277_v29  ;;  %v280_v35 = vld [vmem:[%s5799_s18 + $0x18] sm:$0xff] }
 0x3f0   :  { %v556_v39 = vrot.slane %v555_v36, 2  ;;  %v561_v40 = vrot.slane %v560_v38, 4 }
 0x3f2   :  { %v557_v41 = vadd.f32 %v556_v39, %v555_v36  ;;  %v562_v43 = vadd.f32 %v561_v40, %v560_v38  ;;  %v5379_v36 = vpack.c.bf16 %v280_v35, %v279_v32  ;;  %v901_v40 = vpop.permute.xlu0 %900 }
 0x3f4   :  { %v563_v44 = vrot.slane %v562_v43, 2  ;;  %v558_v45 = vrot.slane %v557_v41, 1 }
 0x3f6   :  { %v564_v47 = vadd.f32 %v563_v44, %v562_v43  ;;  %v559_v51 = vadd.f32 %v558_v45, %v557_v41 }
 0x3f8   :  { %v565_v50 = vrot.slane %v564_v47, 1 }
 0x3fa   :  { %v566_v53 = vadd.f32 %v565_v50, %v564_v47 }
 0x3fc   :  { %v570_v58 = vsel %vm569_vm7, %v566_v53, %v559_v51 }
 0x3fd   :  { %4287 = vmatmul.mubr.msk.f32.vlgmr.msra.gmra.mrb[4].mxu0 %vm293_vm4, %v570_v58 }
 0x3fe   :  { %4694 = vmatpush3.bf16.msra.mxu0 %v5304_v54  ;;  %4311 = vmatprep.mubr.msk.f32.mxu0 %vm4980_vm0, %v4981_v13 }
 0x3ff   :  { %4695 = vmatprep.subr.bf16.mxu0 %v4979_v5 }
 0x402   :  { %4697 = vmatpush3.bf16.msra.mxu0 %v5315_v59 }
 0x403   :  { %4704 = vmatprep.subr.bf16.mxu0 %v4979_v5 }
 0x405   :  { %4312 = vmatmul.mubr.msk.f32.vlgmr.msra.gmra.mrb[6].mxu0 %vm293_vm4, %v5226_v52  ;;  %v5336_v52 = vpack.c.bf16 %v270_v61, %v269_v60 }
 0x406   :  { %4706 = vmatpush3.bf16.msra.mxu0 %v5174_v34  ;;  %4331 = vmatprep.mubr.msk.f32.mxu0 %vm4980_vm0, %v4981_v13 }
 0x407   :  { %4329 = vmatprep.subr.mxu0 %v4981_v13  ;;  %4691 = vmatpush3.bf16.msra.mxu1 %v5336_v52 }
 0x408   :  { %4698 = vmatprep.subr.bf16.mxu1 %v4979_v5 }
 0x40a   :  { %4330 = vmatpush3.msra.mxu0 %v5190_v37 }
 0x40b   :  { %4710 = vmatprep.subr.bf16.mxu0 %v4979_v5 }
 0x4d0   :  { %v639_v0 = vpop.f32.mrb[4].mxu0 }
 0x4d1   :  { %v710_v1 = vadd.f32 %v5255_v3, %v639_v0  ;;  %v4288_v2 = vpop.f32.mrb[5].mxu0  ;;  %v5360_v3 = vld [vmem:[%s5797_s16] ss:$0 sm:$0xff] }
 0x4d3   :  { %v719_v4 = vadd.f32 %v5343_v63, %v710_v1 }
 0x4d5   :  { %v720_v6 = vmax.f32 %v719_v4, 0.0 }
 0x4d7   :  { %4301 = vmatmul.mubr.msk.f32.vlgmr.msra.gmra.mrb[8].mxu1 %vm450_vm5, %v720_v6 }
 0x4d8   :  { %v872_v8 = vpop.f32.mrb[6].mxu0  ;;  %4322 = vmatprep.mubr.msk.f32.mxu1 %vm4980_vm0, %v4981_v13  ;;  %4700 = vmatpush3.bf16.msra.mxu1 %v5373_v33 }
 0x4d9   :  { %v873_v9 = vadd.f32 %v5350_v7, %v872_v8  ;;  %v4313_v10 = vpop.f32.mrb[7].mxu0  ;;  %4701 = vmatprep.subr.bf16.mxu1 %v4979_v5 }
 0x4db   :  { %884 = vrot.lane.b32.xlu1 %v873_v9, %s4983_s25 }
 0x4dc   :  { %4703 = vmatpush3.bf16.msra.mxu1 %v5379_v36 }
 0x4dd   :  { %4707 = vmatprep.subr.bf16.mxu1 %v4979_v5 }
 0x54d   :  { %v885_v23 = vpop.permute.xlu1 %884 }
 0x5aa   :  { %v796_v11 = vpop.f32.mrb[8].mxu1 }
 0x5ab   :  { %v797_v12 = vadd.f32 %v5360_v3, %v796_v11  ;;  %v4302_v15 = vpop.f32.mrb[9].mxu1 }
 0x5ad   :  { %v876_v16 = vadd.f32 %v873_v9, %v797_v12 }
 0x5af   :  { %v3973_v17 = vmul.f32 -1.442695, %v876_v16 }
 0x5b1   :  { %4869 = vpow2.f32 %v3973_v17 }
 0x5bb   :  { %v4870_v18 = vpop.eup %4869 }
 0x5bc   :  { %v880_v20 = vadd.f32 1.0, %v4870_v18 }
 0x5be   :  { %4871 = vrcp.f32 %v880_v20 }
 0x5c8   :  { %v4872_v22 = vpop.eup %4871 }
 0x5c9   :  { %v887_v25 = vmul.f32 %v4872_v22, %v885_v23  ;;  %v894_v39 = vsub.f32 1.0, %v4872_v22  ;;  %v903_v43 = vmul.f32 %v4872_v22, %v901_v40 }
 0x5cb   :  { %889 = vrot.lane.b32.xlu1 %v887_v25, %s4983_s25 }
 0x63d   :  { %v890_v26 = vpop.permute.xlu1 %889 }
 0x63e   :  { %v892_v28 = vadd.f32 %v890_v26, %v797_v12 }
 0x640   :  { %4873 = vtanh.f32 %v892_v28 }
 0x64a   :  { %v4874_v38 = vpop.eup %4873 }
 0x64b   :  { %896 = vrot.lane.b32.xlu1 %v4874_v38, %s4984_s30 }
 0x6bd   :  { %v897_v41 = vpop.permute.xlu1 %896 }
 0x6be   :  { %v899_v44 = vmul.f32 %v897_v41, %v894_v39 }
 0x6c0   :  { %v5385_v45 = vadd.f32 %v903_v43, %v899_v44 }
 0x6c2   :  { %912 = vrot.lane.b32.xlu1 %v5385_v45, %s4984_s30 }
 0x734   :  { %v5389_v47 = vpop.permute.xlu1 %912 }
 0x735   :  { %4323 = vmatmul.mubr.msk.f32.vlgmr.msra.gmra.mrb[10].mxu1 %vm293_vm4, %v5389_v47 }
 0x736   :  { %4709 = vmatpush3.bf16.msra.mxu1 %v5212_v46  ;;  %4338 = vmatprep.mubr.msk.f32.mxu1 %vm4980_vm0, %v4981_v13 }
 0x737   :  { %4716 = vmatprep.subr.bf16.mxu1 %v4979_v5 }
 0x808   :  { %v982_v49 = vpop.f32.mrb[10].mxu1 }
 0x809   :  { %v983_v50 = vadd.f32 %v5400_v48, %v982_v49  ;;  %v4324_v51 = vpop.f32.mrb[11].mxu1 }
 0x80b   :  { %990 = vst [vmem:[#allocation2] sm:$0x3] %v983_v50  ;;  %v987_v53 = vsel %vm986_vm8, %v983_v50, -inf }
 0x80c   :  { %988 = vmax.index.xlane.f32.xlu1 %v987_v53 }
 0x899   :  { %v989_v55 = vpop.xlane.xlu1 %988 }
 0x89a   :  { %vm991_vm9 = vcmp.eq.s32.totalorder %v5204_v42, %v989_v55 }
 0x89b   :  { %v3976_v57 = vsel %vm991_vm9, 1.0, %v4981_v13 }
 0x89c   :  { %4332 = vmatmul.mubr.msk.f32.vlgmr.msra.gmra.mrb[8].mxu0 %vm376_vm2, %v3976_v57 }
 0x89d   :  { %4712 = vmatpush3.bf16.msra.mxu0 %v5268_v19  ;;  %4349 = vmatprep.mubr.msk.f32.mxu0 %vm4980_vm0, %v4981_v13 }
 0x89e   :  { %4713 = vmatprep.subr.bf16.mxu0 %v4979_v5 }
 0x8a1   :  { %4715 = vmatpush3.bf16.msra.mxu0 %v5281_v24 }
 0x8a2   :  { %4722 = vmatprep.subr.bf16.mxu0 %v4979_v5 }
 0x96f   :  { %v1063_v58 = vpop.f32.mrb[8].mxu0 }
 0x970   :  { %v4333_v60 = vpop.f32.mrb[9].mxu0  ;;  %4339 = vmatmul.mubr.msk.f32.vlgmr.msra.gmra.mrb[12].mxu1 %vm450_vm5, %v1063_v58 }
 0x971   :  { %4718 = vmatpush3.bf16.msra.mxu1 %v5238_v56  ;;  %4356 = vmatprep.mubr.msk.f32.mxu1 %vm4980_vm0, %v4981_v13 }
 0x972   :  { %4719 = vmatprep.subr.bf16.mxu1 %v4979_v5 }
 0x974   :  { %4357 = vmatmul.mubr.msk.f32.vlgmr.msra.gmra.mrb[14].mxu1 %vm450_vm5, %v1063_v58 }
 0x975   :  { %4721 = vmatpush3.bf16.msra.mxu1 %v5336_v52  ;;  %4363 = vmatprep.mubr.msk.f32.mxu1 %vm4980_vm0, %v4981_v13 }
 0x976   :  { %4728 = vmatprep.subr.bf16.mxu1 %v4979_v5 }
 0xa43   :  { %v1136_v61 = vpop.f32.mrb[12].mxu1 }
 0xa44   :  { %v1140_v0 = vadd.f32 %v1136_v61, %v5251_v62  ;;  %v4340_v1 = vpop.f32.mrb[13].mxu1 }
 0xa46   :  { %v1141_v2 = vsel %vm525_vm6, %v1140_v0, -inf }
 0xa47   :  { %1142 = vmax.xlane.f32.xlu0 %v1141_v2  ;;  %v1323_v4 = vpop.f32.mrb[14].mxu1 }
 0xa48   :  { %v4358_v6 = vpop.f32.mrb[15].mxu1 }
 0xad4   :  { %v1143_v8 = vpop.xlane.xlu0 %1142 }
 0xad5   :  { %v1144_v9 = vsub.f32 %v1140_v0, %v1143_v8 }
 0xad7   :  { %v1145_v10 = vmul.f32 1.442695, %v1144_v9 }
 0xad9   :  { %4875 = vpow2.f32 %v1145_v10 }
 0xae3   :  { %v4876_v11 = vpop.eup %4875 }
 0xae4   :  { %v1147_v12 = vsel %vm525_vm6, %v4876_v11, 0.0 }
 0xae5   :  { %1148 = vadd.xlane.f32.xlu1 %v1147_v12 }
 0xb72   :  { %v1149_v15 = vpop.xlane.xlu1 %1148 }
 0xb73   :  { %4877 = vrcp.f32 %v1149_v15 }
 0xb7d   :  { %v4878_v16 = vpop.eup %4877 }
 0xb7e   :  { %v1151_v17 = vmul.f32 %v4878_v16, %v4876_v11 }
 0xb80   :  { %v1162_v18 = vrot.slane %v1151_v17, %v5271_v21  ;;  %v1155_v20 = vrot.slane %v1151_v17, %v5260_v14 }
 0xb82   :  { %1164 = vbcast.lane.b32.xlu0 %v1162_v18, 256  ;;  %1157 = vbcast.lane.b32.xlu1 %v1155_v20, 256 }
 0xbf4   :  { %v1165_v22 = vpop.permute.xlu0 %1164  ;;  %v1158_v23 = vpop.permute.xlu1 %1157 }
 0xbf5   :  { %v1167_v25 = vmul.f32 %v1165_v22, %v5293_v30  ;;  %v1166_v26 = vmul.f32 %v1158_v23, %v5289_v27 }
 0xbf7   :  { %v1175_v28 = vsel %vm293_vm4, %v1167_v25, 0.0  ;;  %v1168_v29 = vsel %vm293_vm4, %v1166_v26, 0.0 }
 0xbf8   :  { %v1176_v31 = vrot.slane %v1175_v28, 4  ;;  %v1169_v32 = vrot.slane %v1168_v29, 4 }
 0xbfa   :  { %v1177_v35 = vadd.f32 %v1176_v31, %v1175_v28  ;;  %v1170_v38 = vadd.f32 %v1169_v32, %v1168_v29 }
 0xbfc   :  { %v1178_v39 = vrot.slane %v1177_v35, 2  ;;  %v1171_v40 = vrot.slane %v1170_v38, 2 }
 0xbfe   :  { %v1179_v41 = vadd.f32 %v1178_v39, %v1177_v35  ;;  %v1172_v43 = vadd.f32 %v1171_v40, %v1170_v38 }
 0xc00   :  { %v1180_v44 = vrot.slane %v1179_v41, 1  ;;  %v1173_v49 = vrot.slane %v1172_v43, 1 }
 0xc02   :  { %v1181_v50 = vadd.f32 %v1180_v44, %v1179_v41  ;;  %v1174_v51 = vadd.f32 %v1173_v49, %v1172_v43 }
 0xc04   :  { %v1184_v53 = vsel %vm569_vm7, %v1181_v50, %v1174_v51 }
 0xc05   :  { %4350 = vmatmul.mubr.msk.f32.vlgmr.msra.gmra.mrb[10].mxu0 %vm293_vm4, %v1184_v53 }
 0xc06   :  { %4724 = vmatpush3.bf16.msra.mxu0 %v5304_v54  ;;  %4374 = vmatprep.mubr.msk.f32.mxu0 %vm4980_vm0, %v4981_v13 }
 0xc07   :  { %4725 = vmatprep.subr.bf16.mxu0 %v4979_v5 }
 0xc0a   :  { %4727 = vmatpush3.bf16.msra.mxu0 %v5315_v59 }
 0xc0b   :  { %4734 = vmatprep.subr.bf16.mxu0 %v4979_v5 }
 0xc0d   :  { %4375 = vmatmul.mubr.msk.f32.vlgmr.msra.gmra.mrb[12].mxu0 %vm293_vm4, %v5389_v47 }
 0xc0e   :  { %4736 = vmatpush3.bf16.msra.mxu0 %v5174_v34  ;;  %4394 = vmatprep.mubr.msk.f32.mxu0 %vm4980_vm0, %v4981_v13 }
 0xc0f   :  { %4392 = vmatprep.subr.mxu0 %v4981_v13 }
 0xc12   :  { %4393 = vmatpush3.msra.mxu0 %v5190_v37 }
 0xc13   :  { %4746 = vmatprep.subr.bf16.mxu0 %v4979_v5 }
 0xcd8   :  { %v1253_v55 = vpop.f32.mrb[10].mxu0 }
 0xcd9   :  { %v1324_v57 = vadd.f32 %v1323_v4, %v1253_v55  ;;  %v4351_v58 = vpop.f32.mrb[11].mxu0 }
 0xcdb   :  { %v1327_v60 = vadd.f32 %v5343_v63, %v1324_v57 }
 0xcdd   :  { %v1328_v61 = vmax.f32 %v1327_v60, 0.0 }
 0xcdf   :  { %4364 = vmatmul.mubr.msk.f32.vlgmr.msra.gmra.mrb[16].mxu1 %vm450_vm5, %v1328_v61 }
 0xce0   :  { %v1468_v47 = vpop.f32.mrb[12].mxu0  ;;  %4730 = vmatpush3.bf16.msra.mxu1 %v5373_v33  ;;  %4385 = vmatprep.mubr.msk.f32.mxu1 %vm4980_vm0, %v4981_v13 }
 0xce1   :  { %v1469_v0 = vadd.f32 %v5350_v7, %v1468_v47  ;;  %v4376_v1 = vpop.f32.mrb[13].mxu0  ;;  %4731 = vmatprep.subr.bf16.mxu1 %v4979_v5 }
 0xce3   :  { %1480 = vrot.lane.b32.xlu1 %v1469_v0, %s4983_s25 }
 0xce4   :  { %4733 = vmatpush3.bf16.msra.mxu1 %v5379_v36 }
 0xce5   :  { %4737 = vmatprep.subr.bf16.mxu1 %v4979_v5 }
 0xd55   :  { %v1481_v15 = vpop.permute.xlu1 %1480 }
 0xdb2   :  { %v1398_v2 = vpop.f32.mrb[16].mxu1 }
 0xdb3   :  { %v1399_v4 = vadd.f32 %v5360_v3, %v1398_v2  ;;  %v4365_v6 = vpop.f32.mrb[17].mxu1 }
 0xdb5   :  { %v1472_v8 = vadd.f32 %v1469_v0, %v1399_v4 }
 0xdb7   :  { %v3983_v9 = vmul.f32 -1.442695, %v1472_v8 }
 0xdb9   :  { %4879 = vpow2.f32 %v3983_v9 }
 0xdc3   :  { %v4880_v10 = vpop.eup %4879 }
 0xdc4   :  { %v1476_v11 = vadd.f32 1.0, %v4880_v10 }
 0xdc6   :  { %4881 = vrcp.f32 %v1476_v11 }
 0xdd0   :  { %v4882_v12 = vpop.eup %4881 }
 0xdd1   :  { %v1483_v16 = vmul.f32 %v4882_v12, %v1481_v15  ;;  %v1490_v22 = vsub.f32 1.0, %v4882_v12  ;;  %v1496_v25 = vmul.f32 %v4882_v12, %v5385_v45 }
 0xdd3   :  { %1485 = vrot.lane.b32.xlu1 %v1483_v16, %s4983_s25 }
 0xe45   :  { %v1486_v17 = vpop.permute.xlu1 %1485 }
 0xe46   :  { %v1488_v18 = vadd.f32 %v1486_v17, %v1399_v4 }
 0xe48   :  { %4883 = vtanh.f32 %v1488_v18 }
 0xe52   :  { %v4884_v20 = vpop.eup %4883 }
 0xe53   :  { %1492 = vrot.lane.b32.xlu1 %v4884_v20, %s4984_s30 }
 0xec5   :  { %v1493_v23 = vpop.permute.xlu1 %1492 }
 0xec6   :  { %v1495_v26 = vmul.f32 %v1493_v23, %v1490_v22 }
 0xec8   :  { %v5462_v28 = vadd.f32 %v1496_v25, %v1495_v26 }
 0xeca   :  { %1499 = vrot.lane.b32.xlu0 %v5462_v28, %s4984_s30 }
 0xf3c   :  { %v5466_v29 = vpop.permute.xlu0 %1499 }
 0xf3d   :  { %4386 = vmatmul.mubr.msk.f32.vlgmr.msra.gmra.mrb[18].mxu1 %vm293_vm4, %v5466_v29 }
 0xf3e   :  { %4739 = vmatpush3.bf16.msra.mxu1 %v5212_v46  ;;  %4401 = vmatprep.mubr.msk.f32.mxu1 %vm4980_vm0, %v4981_v13 }
 0xf3f   :  { %4740 = vmatprep.subr.bf16.mxu1 %v4979_v5 }
0x1010   :  { %v1569_v31 = vpop.f32.mrb[18].mxu1 }
0x1011   :  { %v1570_v45 = vadd.f32 %v5400_v48, %v1569_v31  ;;  %v4387_v32 = vpop.f32.mrb[19].mxu1 }
0x1013   :  { %1577 = vst [vmem:[#allocation2 + $0x2] sm:$0x3] %v1570_v45  ;;  %v1573_v35 = vsel %vm986_vm8, %v1570_v45, -inf }
0x1014   :  { %1574 = vmax.index.xlane.f32.xlu1 %v1573_v35 }
0x10a1   :  { %v1575_v38 = vpop.xlane.xlu1 %1574 }
0x10a2   :  { %vm1578_vm10 = vcmp.eq.s32.totalorder %v5204_v42, %v1575_v38 }
0x10a3   :  { %v3985_v39 = vsel %vm1578_vm10, 1.0, %v4981_v13 }
0x10a4   :  { %4395 = vmatmul.mubr.msk.f32.vlgmr.msra.gmra.mrb[14].mxu0 %vm376_vm2, %v3985_v39 }
0x10a5   :  { %4748 = vmatpush3.bf16.msra.mxu0 %v5238_v56  ;;  %4419 = vmatprep.mubr.msk.f32.mxu0 %vm4980_vm0, %v4981_v13 }
0x10a6   :  { %4749 = vmatprep.subr.bf16.mxu0 %v4979_v5 }
0x1177   :  { %v1650_v40 = vpop.f32.mrb[14].mxu0 }
0x1178   :  { %v4396_v41 = vpop.f32.mrb[15].mxu0  ;;  %4402 = vmatmul.mubr.msk.f32.vlgmr.msra.gmra.mrb[20].mxu1 %vm450_vm5, %v1650_v40  ;;  %4420 = vmatmul.mubr.msk.f32.vlgmr.msra.gmra.mrb[16].mxu0 %vm450_vm5, %v1650_v40 }
0x1179   :  { %4742 = vmatpush3.bf16.msra.mxu1 %v5268_v19  ;;  %4412 = vmatprep.mubr.msk.f32.mxu1 %vm4980_vm0, %v4981_v13 }
0x117a   :  { %4743 = vmatprep.subr.bf16.mxu1 %v4979_v5  ;;  %4751 = vmatpush3.bf16.msra.mxu0 %v5336_v52 }
0x117b   :  { %4426 = vmatprep.mubr.msk.f32.mxu0 %vm4980_vm0, %v4981_v13  ;;  %4758 = vmatprep.subr.bf16.mxu0 %v4979_v5 }
0x117d   :  { %4745 = vmatpush3.bf16.msra.mxu1 %v5281_v24 }
0x117e   :  { %4752 = vmatprep.subr.bf16.mxu1 %v4979_v5 }
0x124b   :  { %v1723_v43 = vpop.f32.mrb[20].mxu1  ;;  %v1910_v44 = vpop.f32.mrb[16].mxu0 }
0x124c   :  { %v1727_v49 = vadd.f32 %v1723_v43, %v5251_v62  ;;  %v4403_v50 = vpop.f32.mrb[21].mxu1  ;;  %v4421_v51 = vpop.f32.mrb[17].mxu0 }
0x124e   :  { %v1728_v53 = vsel %vm525_vm6, %v1727_v49, -inf }
0x124f   :  { %1729 = vmax.xlane.f32.xlu0 %v1728_v53 }
0x12dc   :  { %v1730_v55 = vpop.xlane.xlu0 %1729 }
0x12dd   :  { %v1731_v57 = vsub.f32 %v1727_v49, %v1730_v55 }
0x12df   :  { %v1732_v58 = vmul.f32 1.442695, %v1731_v57 }
0x12e1   :  { %4885 = vpow2.f32 %v1732_v58 }
0x12eb   :  { %v4886_v60 = vpop.eup %4885 }
0x12ec   :  { %v1734_v61 = vsel %vm525_vm6, %v4886_v60, 0.0 }
0x12ed   :  { %1735 = vadd.xlane.f32.xlu0 %v1734_v61 }
0x137a   :  { %v1736_v47 = vpop.xlane.xlu0 %1735 }
0x137b   :  { %4887 = vrcp.f32 %v1736_v47 }
0x1385   :  { %v4888_v0 = vpop.eup %4887 }
0x1386   :  { %v1738_v1 = vmul.f32 %v4888_v0, %v4886_v60 }
0x1388   :  { %v1749_v2 = vrot.slane %v1738_v1, %v5271_v21  ;;  %v1742_v4 = vrot.slane %v1738_v1, %v5260_v14 }
0x138a   :  { %1751 = vbcast.lane.b32.xlu0 %v1749_v2, 256  ;;  %1744 = vbcast.lane.b32.xlu1 %v1742_v4, 256 }
0x13fc   :  { %v1752_v6 = vpop.permute.xlu0 %1751  ;;  %v1745_v8 = vpop.permute.xlu1 %1744 }
0x13fd   :  { %v1754_v9 = vmul.f32 %v1752_v6, %v5293_v30  ;;  %v1753_v10 = vmul.f32 %v1745_v8, %v5289_v27 }
0x13ff   :  { %v1762_v11 = vsel %vm293_vm4, %v1754_v9, 0.0  ;;  %v1755_v12 = vsel %vm293_vm4, %v1753_v10, 0.0 }
0x1400   :  { %v1763_v15 = vrot.slane %v1762_v11, 4  ;;  %v1756_v16 = vrot.slane %v1755_v12, 4 }
0x1402   :  { %v1764_v17 = vadd.f32 %v1763_v15, %v1762_v11  ;;  %v1757_v18 = vadd.f32 %v1756_v16, %v1755_v12 }
0x1404   :  { %v1765_v20 = vrot.slane %v1764_v17, 2  ;;  %v1758_v22 = vrot.slane %v1757_v18, 2 }
0x1406   :  { %v1766_v23 = vadd.f32 %v1765_v20, %v1764_v17  ;;  %v1759_v25 = vadd.f32 %v1758_v22, %v1757_v18 }
0x1408   :  { %v1767_v26 = vrot.slane %v1766_v23, 1  ;;  %v1760_v31 = vrot.slane %v1759_v25, 1 }
0x140a   :  { %v1768_v45 = vadd.f32 %v1767_v26, %v1766_v23  ;;  %v1761_v32 = vadd.f32 %v1760_v31, %v1759_v25 }
0x140c   :  { %v1771_v35 = vsel %vm569_vm7, %v1768_v45, %v1761_v32 }
0x140d   :  { %4413 = vmatmul.mubr.msk.f32.vlgmr.msra.gmra.mrb[22].mxu1 %vm293_vm4, %v1771_v35 }
0x140e   :  { %4754 = vmatpush3.bf16.msra.mxu1 %v5304_v54  ;;  %4437 = vmatprep.mubr.msk.f32.mxu1 %vm4980_vm0, %v4981_v13 }
0x140f   :  { %4755 = vmatprep.subr.bf16.mxu1 %v4979_v5 }
0x1412   :  { %4757 = vmatpush3.bf16.msra.mxu1 %v5315_v59 }
0x1413   :  { %4764 = vmatprep.subr.bf16.mxu1 %v4979_v5 }
0x1415   :  { %4438 = vmatmul.mubr.msk.f32.vlgmr.msra.gmra.mrb[24].mxu1 %vm293_vm4, %v5466_v29 }
0x1416   :  { %4766 = vmatpush3.bf16.msra.mxu1 %v5174_v34  ;;  %4457 = vmatprep.mubr.msk.f32.mxu1 %vm4980_vm0, %v4981_v13 }
0x1417   :  { %4455 = vmatprep.subr.mxu1 %v4981_v13 }
0x141a   :  { %4456 = vmatpush3.msra.mxu1 %v5190_v37 }
0x141b   :  { %4776 = vmatprep.subr.bf16.mxu1 %v4979_v5 }
0x14e0   :  { %v1840_v38 = vpop.f32.mrb[22].mxu1 }
0x14e1   :  { %v1911_v39 = vadd.f32 %v1910_v44, %v1840_v38  ;;  %v4414_v40 = vpop.f32.mrb[23].mxu1 }
0x14e3   :  { %v1914_v41 = vadd.f32 %v5343_v63, %v1911_v39 }
0x14e5   :  { %v1915_v43 = vmax.f32 %v1914_v41, 0.0 }
0x14e7   :  { %4427 = vmatmul.mubr.msk.f32.vlgmr.msra.gmra.mrb[18].mxu0 %vm450_vm5, %v1915_v43 }
0x14e8   :  { %v2055_v29 = vpop.f32.mrb[24].mxu1  ;;  %4760 = vmatpush3.bf16.msra.mxu0 %v5373_v33  ;;  %4448 = vmatprep.mubr.msk.f32.mxu0 %vm4980_vm0, %v4981_v13 }
0x14e9   :  { %v2056_v49 = vadd.f32 %v5350_v7, %v2055_v29  ;;  %v4439_v50 = vpop.f32.mrb[25].mxu1  ;;  %4761 = vmatprep.subr.bf16.mxu0 %v4979_v5 }
0x14eb   :  { %2067 = vrot.lane.b32.xlu1 %v2056_v49, %s4983_s25 }
0x14ec   :  { %4763 = vmatpush3.bf16.msra.mxu0 %v5379_v36 }
0x14ed   :  { %4767 = vmatprep.subr.bf16.mxu0 %v4979_v5 }
0x155d   :  { %v2068_v47 = vpop.permute.xlu1 %2067 }
0x15ba   :  { %v1985_v44 = vpop.f32.mrb[18].mxu0 }
0x15bb   :  { %v1986_v51 = vadd.f32 %v5360_v3, %v1985_v44  ;;  %v4428_v53 = vpop.f32.mrb[19].mxu0 }
0x15bd   :  { %v2059_v55 = vadd.f32 %v2056_v49, %v1986_v51 }
0x15bf   :  { %v3992_v57 = vmul.f32 -1.442695, %v2059_v55 }
0x15c1   :  { %4889 = vpow2.f32 %v3992_v57 }
0x15cb   :  { %v4890_v58 = vpop.eup %4889 }
0x15cc   :  { %v2063_v60 = vadd.f32 1.0, %v4890_v58 }
0x15ce   :  { %4891 = vrcp.f32 %v2063_v60 }
0x15d8   :  { %v4892_v61 = vpop.eup %4891 }
0x15d9   :  { %v2070_v0 = vmul.f32 %v4892_v61, %v2068_v47  ;;  %v2077_v6 = vsub.f32 1.0, %v4892_v61  ;;  %v2083_v9 = vmul.f32 %v4892_v61, %v5462_v28 }
0x15db   :  { %2072 = vrot.lane.b32.xlu1 %v2070_v0, %s4983_s25 }
0x164d   :  { %v2073_v1 = vpop.permute.xlu1 %2072 }
0x164e   :  { %v2075_v2 = vadd.f32 %v2073_v1, %v1986_v51 }
0x1650   :  { %4893 = vtanh.f32 %v2075_v2 }
0x165a   :  { %v4894_v4 = vpop.eup %4893 }
0x165b   :  { %2079 = vrot.lane.b32.xlu0 %v4894_v4, %s4984_s30 }
0x16cd   :  { %v2080_v8 = vpop.permute.xlu0 %2079 }
0x16ce   :  { %v2082_v10 = vmul.f32 %v2080_v8, %v2077_v6 }
0x16d0   :  { %v5534_v11 = vadd.f32 %v2083_v9, %v2082_v10 }
0x16d2   :  { %2086 = vrot.lane.b32.xlu1 %v5534_v11, %s4984_s30 }
0x1744   :  { %v5538_v12 = vpop.permute.xlu1 %2086 }
0x1745   :  { %4449 = vmatmul.mubr.msk.f32.vlgmr.msra.gmra.mrb[20].mxu0 %vm293_vm4, %v5538_v12 }
0x1746   :  { %4769 = vmatpush3.bf16.msra.mxu0 %v5212_v46  ;;  %4464 = vmatprep.mubr.msk.f32.mxu0 %vm4980_vm0, %v4981_v13 }
0x1747   :  { %4770 = vmatprep.subr.bf16.mxu0 %v4979_v5 }
0x1818   :  { %v2156_v15 = vpop.f32.mrb[20].mxu0 }
0x1819   :  { %v2157_v28 = vadd.f32 %v5400_v48, %v2156_v15  ;;  %v4450_v16 = vpop.f32.mrb[21].mxu0 }
0x181b   :  { %2164 = vst [vmem:[#allocation2 + $0x4] sm:$0x3] %v2157_v28  ;;  %v2160_v17 = vsel %vm986_vm8, %v2157_v28, -inf }
0x181c   :  { %2161 = vmax.index.xlane.f32.xlu0 %v2160_v17 }
0x18a9   :  { %v2162_v18 = vpop.xlane.xlu0 %2161 }
0x18aa   :  { %vm2165_vm11 = vcmp.eq.s32.totalorder %v5204_v42, %v2162_v18 }
0x18ab   :  { %v3994_v20 = vsel %vm2165_vm11, 1.0, %v4981_v13 }
0x18ac   :  { %4458 = vmatmul.mubr.msk.f32.vlgmr.msra.gmra.mrb[26].mxu1 %vm376_vm2, %v3994_v20 }
0x18ad   :  { %4778 = vmatpush3.bf16.msra.mxu1 %v5238_v56  ;;  %4482 = vmatprep.mubr.msk.f32.mxu1 %vm4980_vm0, %v4981_v13 }
0x18ae   :  { %4779 = vmatprep.subr.bf16.mxu1 %v4979_v5 }
0x197f   :  { %v2237_v22 = vpop.f32.mrb[26].mxu1 }
0x1980   :  { %v4459_v23 = vpop.f32.mrb[27].mxu1  ;;  %4465 = vmatmul.mubr.msk.f32.vlgmr.msra.gmra.mrb[22].mxu0 %vm450_vm5, %v2237_v22  ;;  %4483 = vmatmul.mubr.msk.f32.vlgmr.msra.gmra.mrb[28].mxu1 %vm450_vm5, %v2237_v22 }
0x1981   :  { %4772 = vmatpush3.bf16.msra.mxu0 %v5268_v19  ;;  %4475 = vmatprep.mubr.msk.f32.mxu0 %vm4980_vm0, %v4981_v13 }
0x1982   :  { %4773 = vmatprep.subr.bf16.mxu0 %v4979_v5  ;;  %4781 = vmatpush3.bf16.msra.mxu1 %v5336_v52 }
0x1983   :  { %4489 = vmatprep.mubr.msk.f32.mxu1 %vm4980_vm0, %v4981_v13  ;;  %4788 = vmatprep.subr.bf16.mxu1 %v4979_v5 }
0x1985   :  { %4775 = vmatpush3.bf16.msra.mxu0 %v5281_v24 }
0x1986   :  { %4782 = vmatprep.subr.bf16.mxu0 %v4979_v5 }
0x1a53   :  { %v2310_v25 = vpop.f32.mrb[22].mxu0  ;;  %v2497_v26 = vpop.f32.mrb[28].mxu1 }
0x1a54   :  { %v2314_v31 = vadd.f32 %v2310_v25, %v5251_v62  ;;  %v4466_v45 = vpop.f32.mrb[23].mxu0  ;;  %v4484_v32 = vpop.f32.mrb[29].mxu1 }
0x1a56   :  { %v2315_v35 = vsel %vm525_vm6, %v2314_v31, -inf }
0x1a57   :  { %2316 = vmax.xlane.f32.xlu1 %v2315_v35 }
0x1ae4   :  { %v2317_v38 = vpop.xlane.xlu1 %2316 }
0x1ae5   :  { %v2318_v39 = vsub.f32 %v2314_v31, %v2317_v38 }
0x1ae7   :  { %v2319_v40 = vmul.f32 1.442695, %v2318_v39 }
0x1ae9   :  { %4895 = vpow2.f32 %v2319_v40 }
0x1af3   :  { %v4896_v41 = vpop.eup %4895 }
0x1af4   :  { %v2321_v43 = vsel %vm525_vm6, %v4896_v41, 0.0 }
0x1af5   :  { %2322 = vadd.xlane.f32.xlu0 %v2321_v43 }
0x1b82   :  { %v2323_v29 = vpop.xlane.xlu0 %2322 }
0x1b83   :  { %4897 = vrcp.f32 %v2323_v29 }
0x1b8d   :  { %v4898_v49 = vpop.eup %4897 }
0x1b8e   :  { %v2325_v50 = vmul.f32 %v4898_v49, %v4896_v41 }
0x1b90   :  { %v2336_v44 = vrot.slane %v2325_v50, %v5271_v21  ;;  %v2329_v51 = vrot.slane %v2325_v50, %v5260_v14 }
0x1b92   :  { %2338 = vbcast.lane.b32.xlu1 %v2336_v44, 256  ;;  %2331 = vbcast.lane.b32.xlu0 %v2329_v51, 256 }
0x1c04   :  { %v2339_v53 = vpop.permute.xlu1 %2338  ;;  %v2332_v55 = vpop.permute.xlu0 %2331 }
0x1c05   :  { %v2341_v57 = vmul.f32 %v2339_v53, %v5293_v30  ;;  %v2340_v58 = vmul.f32 %v2332_v55, %v5289_v27 }
0x1c07   :  { %v2349_v60 = vsel %vm293_vm4, %v2341_v57, 0.0  ;;  %v2342_v61 = vsel %vm293_vm4, %v2340_v58, 0.0 }
0x1c08   :  { %v2350_v47 = vrot.slane %v2349_v60, 4  ;;  %v2343_v0 = vrot.slane %v2342_v61, 4 }
0x1c0a   :  { %v2351_v1 = vadd.f32 %v2350_v47, %v2349_v60  ;;  %v2344_v2 = vadd.f32 %v2343_v0, %v2342_v61 }
0x1c0c   :  { %v2352_v4 = vrot.slane %v2351_v1, 2  ;;  %v2345_v6 = vrot.slane %v2344_v2, 2 }
0x1c0e   :  { %v2353_v8 = vadd.f32 %v2352_v4, %v2351_v1  ;;  %v2346_v9 = vadd.f32 %v2345_v6, %v2344_v2 }
0x1c10   :  { %v2354_v10 = vrot.slane %v2353_v8, 1  ;;  %v2347_v15 = vrot.slane %v2346_v9, 1 }
0x1c12   :  { %v2355_v28 = vadd.f32 %v2354_v10, %v2353_v8  ;;  %v2348_v16 = vadd.f32 %v2347_v15, %v2346_v9 }
0x1c14   :  { %v2358_v17 = vsel %vm569_vm7, %v2355_v28, %v2348_v16 }
0x1c15   :  { %4476 = vmatmul.mubr.msk.f32.vlgmr.msra.gmra.mrb[24].mxu0 %vm293_vm4, %v2358_v17 }
0x1c16   :  { %4784 = vmatpush3.bf16.msra.mxu0 %v5304_v54  ;;  %4500 = vmatprep.mubr.msk.f32.mxu0 %vm4980_vm0, %v4981_v13 }
0x1c17   :  { %4785 = vmatprep.subr.bf16.mxu0 %v4979_v5 }
0x1c1a   :  { %4787 = vmatpush3.bf16.msra.mxu0 %v5315_v59 }
0x1c1b   :  { %4794 = vmatprep.subr.bf16.mxu0 %v4979_v5 }
0x1c1d   :  { %4501 = vmatmul.mubr.msk.f32.vlgmr.msra.gmra.mrb[26].mxu0 %vm293_vm4, %v5538_v12 }
0x1c1e   :  { %4796 = vmatpush3.bf16.msra.mxu0 %v5174_v34  ;;  %4520 = vmatprep.mubr.msk.f32.mxu0 %vm4980_vm0, %v4981_v13 }
0x1c1f   :  { %4518 = vmatprep.subr.mxu0 %v4981_v13 }
0x1c22   :  { %4519 = vmatpush3.msra.mxu0 %v5190_v37 }
0x1c23   :  { %4806 = vmatprep.subr.bf16.mxu0 %v4979_v5 }
0x1ce8   :  { %v2427_v18 = vpop.f32.mrb[24].mxu0 }
0x1ce9   :  { %v2498_v20 = vadd.f32 %v2497_v26, %v2427_v18  ;;  %v4477_v22 = vpop.f32.mrb[25].mxu0 }
0x1ceb   :  { %v2501_v23 = vadd.f32 %v5343_v63, %v2498_v20 }
0x1ced   :  { %v2502_v25 = vmax.f32 %v2501_v23, 0.0 }
0x1cef   :  { %4490 = vmatmul.mubr.msk.f32.vlgmr.msra.gmra.mrb[30].mxu1 %vm450_vm5, %v2502_v25 }
0x1cf0   :  { %v2642_v12 = vpop.f32.mrb[26].mxu0  ;;  %4790 = vmatpush3.bf16.msra.mxu1 %v5373_v33  ;;  %4511 = vmatprep.mubr.msk.f32.mxu1 %vm4980_vm0, %v4981_v13 }
0x1cf1   :  { %v2643_v31 = vadd.f32 %v5350_v7, %v2642_v12  ;;  %v4502_v45 = vpop.f32.mrb[27].mxu0  ;;  %4791 = vmatprep.subr.bf16.mxu1 %v4979_v5 }
0x1cf3   :  { %2654 = vrot.lane.b32.xlu1 %v2643_v31, %s4983_s25 }
0x1cf4   :  { %4793 = vmatpush3.bf16.msra.mxu1 %v5379_v36 }
0x1cf5   :  { %4797 = vmatprep.subr.bf16.mxu1 %v4979_v5 }
0x1d65   :  { %v2655_v43 = vpop.permute.xlu1 %2654 }
0x1dc2   :  { %v2572_v37 = vpop.f32.mrb[30].mxu1 }
0x1dc3   :  { %v2573_v26 = vadd.f32 %v5360_v3, %v2572_v37  ;;  %v4491_v32 = vpop.f32.mrb[31].mxu1 }
0x1dc5   :  { %v2646_v35 = vadd.f32 %v2643_v31, %v2573_v26 }
0x1dc7   :  { %v4001_v38 = vmul.f32 -1.442695, %v2646_v35 }
0x1dc9   :  { %4899 = vpow2.f32 %v4001_v38 }
0x1dd3   :  { %v4900_v39 = vpop.eup %4899 }
0x1dd4   :  { %v2650_v40 = vadd.f32 1.0, %v4900_v39 }
0x1dd6   :  { %4901 = vrcp.f32 %v2650_v40 }
0x1de0   :  { %v4902_v41 = vpop.eup %4901 }
0x1de1   :  { %v2657_v29 = vmul.f32 %v4902_v41, %v2655_v43  ;;  %v2664_v51 = vsub.f32 1.0, %v4902_v41  ;;  %v2670_v55 = vmul.f32 %v4902_v41, %v5534_v11 }
0x1de3   :  { %2659 = vrot.lane.b32.xlu0 %v2657_v29, %s4983_s25 }
0x1e55   :  { %v2660_v49 = vpop.permute.xlu0 %2659 }
0x1e56   :  { %v2662_v50 = vadd.f32 %v2660_v49, %v2573_v26 }
0x1e58   :  { %4903 = vtanh.f32 %v2662_v50 }
0x1e62   :  { %v4904_v44 = vpop.eup %4903 }
0x1e63   :  { %2666 = vrot.lane.b32.xlu1 %v4904_v44, %s4984_s30 }
0x1ed5   :  { %v2667_v53 = vpop.permute.xlu1 %2666 }
0x1ed6   :  { %v2669_v57 = vmul.f32 %v2667_v53, %v2664_v51 }
0x1ed8   :  { %v5606_v58 = vadd.f32 %v2670_v55, %v2669_v57 }
0x1eda   :  { %2673 = vrot.lane.b32.xlu0 %v5606_v58, %s4984_s30 }
0x1f4c   :  { %v5610_v60 = vpop.permute.xlu0 %2673 }
0x1f4d   :  { %4512 = vmatmul.mubr.msk.f32.vlgmr.msra.gmra.mrb[32].mxu1 %vm293_vm4, %v5610_v60 }
0x1f4e   :  { %4799 = vmatpush3.bf16.msra.mxu1 %v5212_v46  ;;  %4527 = vmatprep.mubr.msk.f32.mxu1 %vm4980_vm0, %v4981_v13 }
0x1f4f   :  { %4800 = vmatprep.subr.bf16.mxu1 %v4979_v5 }
0x2020   :  { %v2743_v61 = vpop.f32.mrb[32].mxu1 }
0x2021   :  { %v2744_v11 = vadd.f32 %v5400_v48, %v2743_v61  ;;  %v4513_v47 = vpop.f32.mrb[33].mxu1 }
0x2023   :  { %2751 = vst [vmem:[#allocation2 + $0x6] sm:$0x3] %v2744_v11  ;;  %v2747_v0 = vsel %vm986_vm8, %v2744_v11, -inf }
0x2024   :  { %2748 = vmax.index.xlane.f32.xlu1 %v2747_v0  ;;  %v4925_v0 = vld [vmem:[%s5788_s7 + $0x10] sm:$0xff] }
0x20b1   :  { %v2749_v1 = vpop.xlane.xlu1 %2748 }
0x20b2   :  { %vm2752_vm12 = vcmp.eq.s32.totalorder %v5204_v42, %v2749_v1 }
0x20b3   :  { %v4003_v2 = vsel %vm2752_vm12, 1.0, %v4981_v13 }
0x20b4   :  { %4521 = vmatmul.mubr.msk.f32.vlgmr.msra.gmra.mrb[28].mxu0 %vm376_vm2, %v4003_v2 }
0x20b5   :  { %4808 = vmatpush3.bf16.msra.mxu0 %v5238_v56  ;;  %4545 = vmatprep.mubr.msk.f32.mxu0 %vm4980_vm0, %v4981_v13 }
0x20b6   :  { %4809 = vmatprep.subr.bf16.mxu0 %v4979_v5 }
0x2187   :  { %v2824_v4 = vpop.f32.mrb[28].mxu0 }
0x2188   :  { %v4522_v6 = vpop.f32.mrb[29].mxu0  ;;  %4528 = vmatmul.mubr.msk.f32.vlgmr.msra.gmra.mrb[34].mxu1 %vm450_vm5, %v2824_v4  ;;  %4546 = vmatmul.mubr.msk.f32.vlgmr.msra.gmra.mrb[30].mxu0 %vm450_vm5, %v2824_v4 }
0x2189   :  { %4802 = vmatpush3.bf16.msra.mxu1 %v5268_v19  ;;  %4538 = vmatprep.mubr.msk.f32.mxu1 %vm4980_vm0, %v4981_v13 }
0x218a   :  { %4803 = vmatprep.subr.bf16.mxu1 %v4979_v5  ;;  %4811 = vmatpush3.bf16.msra.mxu0 %v5336_v52 }
0x218b   :  { %4552 = vmatprep.mubr.msk.f32.mxu0 %vm4980_vm0, %v4981_v13  ;;  %4818 = vmatprep.subr.bf16.mxu0 %v4979_v5 }
0x218d   :  { %4805 = vmatpush3.bf16.msra.mxu1 %v5281_v24 }
0x218e   :  { %4812 = vmatprep.subr.bf16.mxu1 %v4979_v5 }
0x225b   :  { %v2897_v8 = vpop.f32.mrb[34].mxu1  ;;  %v3084_v9 = vpop.f32.mrb[30].mxu0 }
0x225c   :  { %v2901_v10 = vadd.f32 %v2897_v8, %v5251_v62  ;;  %v4529_v15 = vpop.f32.mrb[35].mxu1  ;;  %v4547_v28 = vpop.f32.mrb[31].mxu0 }
0x225e   :  { %v2902_v16 = vsel %vm525_vm6, %v2901_v10, -inf }
0x225f   :  { %2903 = vmax.xlane.f32.xlu0 %v2902_v16 }
0x22ec   :  { %v2904_v17 = vpop.xlane.xlu0 %2903 }
0x22ed   :  { %v2905_v18 = vsub.f32 %v2901_v10, %v2904_v17 }
0x22ef   :  { %v2906_v20 = vmul.f32 1.442695, %v2905_v18 }
0x22f1   :  { %4905 = vpow2.f32 %v2906_v20 }
0x22fb   :  { %v4906_v22 = vpop.eup %4905 }
0x22fc   :  { %v2908_v23 = vsel %vm525_vm6, %v4906_v22, 0.0 }
0x22fd   :  { %2909 = vadd.xlane.f32.xlu0 %v2908_v23 }
0x238a   :  { %v2910_v25 = vpop.xlane.xlu0 %2909 }
0x238b   :  { %4907 = vrcp.f32 %v2910_v25 }
0x2395   :  { %v4908_v12 = vpop.eup %4907 }
0x2396   :  { %v2912_v31 = vmul.f32 %v4908_v12, %v4906_v22 }
0x2398   :  { %v2923_v45 = vrot.slane %v2912_v31, %v5271_v21  ;;  %v2916_v37 = vrot.slane %v2912_v31, %v5260_v14 }
0x239a   :  { %2925 = vbcast.lane.b32.xlu0 %v2923_v45, 256  ;;  %2918 = vbcast.lane.b32.xlu1 %v2916_v37, 256 }
0x240c   :  { %v2926_v26 = vpop.permute.xlu0 %2925  ;;  %v2919_v32 = vpop.permute.xlu1 %2918 }
0x240d   :  { %v2928_v35 = vmul.f32 %v2926_v26, %v5293_v30  ;;  %v2927_v38 = vmul.f32 %v2919_v32, %v5289_v27 }
0x240f   :  { %v2936_v39 = vsel %vm293_vm4, %v2928_v35, 0.0  ;;  %v2929_v40 = vsel %vm293_vm4, %v2927_v38, 0.0 }
0x2410   :  { %v2937_v41 = vrot.slane %v2936_v39, 4  ;;  %v2930_v43 = vrot.slane %v2929_v40, 4 }
0x2412   :  { %v2938_v29 = vadd.f32 %v2937_v41, %v2936_v39  ;;  %v2931_v49 = vadd.f32 %v2930_v43, %v2929_v40 }
0x2414   :  { %v2939_v50 = vrot.slane %v2938_v29, 2  ;;  %v2932_v44 = vrot.slane %v2931_v49, 2 }
0x2416   :  { %v2940_v51 = vadd.f32 %v2939_v50, %v2938_v29  ;;  %v2933_v53 = vadd.f32 %v2932_v44, %v2931_v49 }
0x2418   :  { %v2941_v55 = vrot.slane %v2940_v51, 1  ;;  %v2934_v57 = vrot.slane %v2933_v53, 1 }
0x241a   :  { %v2942_v61 = vadd.f32 %v2941_v55, %v2940_v51  ;;  %v2935_v11 = vadd.f32 %v2934_v57, %v2933_v53 }
0x241c   :  { %v2945_v47 = vsel %vm569_vm7, %v2942_v61, %v2935_v11 }
0x241d   :  { %4539 = vmatmul.mubr.msk.f32.vlgmr.msra.gmra.mrb[36].mxu1 %vm293_vm4, %v2945_v47 }
0x241e   :  { %4814 = vmatpush3.bf16.msra.mxu1 %v5304_v54  ;;  %4563 = vmatprep.mubr.msk.f32.mxu1 %vm4980_vm0, %v4981_v13 }
0x241f   :  { %4815 = vmatprep.subr.bf16.mxu1 %v4979_v5 }
0x2422   :  { %4817 = vmatpush3.bf16.msra.mxu1 %v5315_v59 }
0x2423   :  { %4824 = vmatprep.subr.bf16.mxu1 %v4979_v5 }
0x2425   :  { %4564 = vmatmul.mubr.msk.f32.vlgmr.msra.gmra.mrb[38].mxu1 %vm293_vm4, %v5610_v60 }
0x2426   :  { %4826 = vmatpush3.bf16.msra.mxu1 %v5174_v34  ;;  %4583 = vmatprep.mubr.msk.f32.mxu1 %vm4980_vm0, %v4981_v13 }
0x2427   :  { %4581 = vmatprep.subr.mxu1 %v4981_v13 }
0x242a   :  { %4582 = vmatpush3.msra.mxu1 %v4925_v0 }
0x242b   :  { %4836 = vmatprep.subr.bf16.mxu1 %v4979_v5 }
0x24f0   :  { %v3014_v1 = vpop.f32.mrb[36].mxu1 }
0x24f1   :  { %v3085_v2 = vadd.f32 %v3084_v9, %v3014_v1  ;;  %v4540_v4 = vpop.f32.mrb[37].mxu1 }
0x24f3   :  { %v3088_v6 = vadd.f32 %v5343_v63, %v3085_v2 }
0x24f5   :  { %v3089_v60 = vmax.f32 %v3088_v6, 0.0 }
0x24f7   :  { %4553 = vmatmul.mubr.msk.f32.vlgmr.msra.gmra.mrb[32].mxu0 %vm450_vm5, %v3089_v60 }
0x24f8   :  { %v3229_v34 = vpop.f32.mrb[38].mxu1  ;;  %4820 = vmatpush3.bf16.msra.mxu0 %v5373_v33  ;;  %4574 = vmatprep.mubr.msk.f32.mxu0 %vm4980_vm0, %v4981_v13 }
0x24f9   :  { %v3230_v8 = vadd.f32 %v5350_v7, %v3229_v34  ;;  %v4565_v10 = vpop.f32.mrb[39].mxu1  ;;  %4821 = vmatprep.subr.bf16.mxu0 %v4979_v5 }
0x24fb   :  { %3241 = vrot.lane.b32.xlu1 %v3230_v8, %s4983_s25 }
0x24fc   :  { %4823 = vmatpush3.bf16.msra.mxu0 %v5379_v36 }
0x24fd   :  { %4827 = vmatprep.subr.bf16.mxu0 %v4979_v5 }
0x256d   :  { %v3242_v20 = vpop.permute.xlu1 %3241 }
0x25ca   :  { %v3159_v63 = vpop.f32.mrb[32].mxu0 }
0x25cb   :  { %v3160_v9 = vadd.f32 %v5360_v3, %v3159_v63  ;;  %v4554_v15 = vpop.f32.mrb[33].mxu0 }
0x25cd   :  { %v3233_v28 = vadd.f32 %v3230_v8, %v3160_v9 }
0x25cf   :  { %v4010_v16 = vmul.f32 -1.442695, %v3233_v28 }
0x25d1   :  { %4909 = vpow2.f32 %v4010_v16 }
0x25db   :  { %v4910_v17 = vpop.eup %4909 }
0x25dc   :  { %v3237_v18 = vadd.f32 1.0, %v4910_v17 }
0x25de   :  { %4911 = vrcp.f32 %v3237_v18 }
0x25e8   :  { %v4912_v7 = vpop.eup %4911 }
0x25e9   :  { %v3244_v22 = vmul.f32 %v4912_v7, %v3242_v20  ;;  %v3251_v31 = vsub.f32 1.0, %v4912_v7  ;;  %v3257_v45 = vmul.f32 %v4912_v7, %v5606_v58  ;;  %v4926_v7 = vld [vmem:[%s5794_s13] ss:$0 sm:$0xff] }
0x25eb   :  { %3246 = vrot.lane.b32.xlu1 %v3244_v22, %s4983_s25 }
0x265d   :  { %v3247_v23 = vpop.permute.xlu1 %3246 }
0x265e   :  { %v3249_v25 = vadd.f32 %v3247_v23, %v3160_v9 }
0x2660   :  { %4913 = vtanh.f32 %v3249_v25 }
0x266a   :  { %v4914_v12 = vpop.eup %4913 }
0x266b   :  { %3253 = vrot.lane.b32.xlu0 %v4914_v12, %s4984_s30 }
0x26dd   :  { %v3254_v3 = vpop.permute.xlu0 %3253 }
0x26de   :  { %v3256_v37 = vmul.f32 %v3254_v3, %v3251_v31 }
0x26e0   :  { %v5680_v26 = vadd.f32 %v3257_v45, %v3256_v37 }
0x26e2   :  { %3260 = vrot.lane.b32.xlu1 %v5680_v26, %s4984_s30 }
0x2754   :  { %v5684_v32 = vpop.permute.xlu1 %3260 }
0x2755   :  { %4575 = vmatmul.mubr.msk.f32.vlgmr.msra.gmra.mrb[34].mxu0 %vm293_vm4, %v5684_v32 }
0x2756   :  { %4829 = vmatpush3.bf16.msra.mxu0 %v5212_v46  ;;  %4590 = vmatprep.mubr.msk.f32.mxu0 %vm4980_vm0, %v4981_v13 }
0x2757   :  { %4830 = vmatprep.subr.bf16.mxu0 %v4979_v5 }
0x2828   :  { %v3330_v35 = vpop.f32.mrb[34].mxu0 }
0x2829   :  { %v3331_v58 = vadd.f32 %v5400_v48, %v3330_v35  ;;  %v4576_v38 = vpop.f32.mrb[35].mxu0 }
0x282b   :  { %3338 = vst [vmem:[#allocation2 + $0x8] sm:$0x3] %v3331_v58  ;;  %v3334_v39 = vsel %vm986_vm8, %v3331_v58, -inf }
0x282c   :  { %3335 = vmax.index.xlane.f32.xlu0 %v3334_v39 }
0x28b9   :  { %v3336_v40 = vpop.xlane.xlu0 %3335 }
0x28ba   :  { %vm3339_vm13 = vcmp.eq.s32.totalorder %v5204_v42, %v3336_v40 }
0x28bb   :  { %v4012_v41 = vsel %vm3339_vm13, 1.0, %v4981_v13 }
0x28bc   :  { %4584 = vmatmul.mubr.msk.f32.vlgmr.msra.gmra.mrb[40].mxu1 %vm376_vm2, %v4012_v41 }
0x28bd   :  { %4838 = vmatpush3.bf16.msra.mxu1 %v5238_v56  ;;  %4608 = vmatprep.mubr.msk.f32.mxu1 %vm4980_vm0, %v4981_v13 }
0x28be   :  { %4839 = vmatprep.subr.bf16.mxu1 %v4979_v5 }
0x298f   :  { %v3411_v46 = vpop.f32.mrb[40].mxu1 }
0x2990   :  { %v4585_v48 = vpop.f32.mrb[41].mxu1  ;;  %4591 = vmatmul.mubr.msk.f32.vlgmr.msra.gmra.mrb[36].mxu0 %vm450_vm5, %v3411_v46  ;;  %4609 = vmatmul.mubr.msk.f32.vlgmr.msra.gmra.mrb[42].mxu1 %vm450_vm5, %v3411_v46 }
0x2991   :  { %4832 = vmatpush3.bf16.msra.mxu0 %v5268_v19  ;;  %4601 = vmatprep.mubr.msk.f32.mxu0 %vm4980_vm0, %v4981_v13 }
0x2992   :  { %4833 = vmatprep.subr.bf16.mxu0 %v4979_v5  ;;  %4841 = vmatpush3.bf16.msra.mxu1 %v5336_v52 }
0x2993   :  { %4615 = vmatprep.mubr.msk.f32.mxu1 %vm4980_vm0, %v4981_v13  ;;  %4848 = vmatprep.subr.bf16.mxu1 %v4979_v5 }
0x2995   :  { %4835 = vmatpush3.bf16.msra.mxu0 %v5281_v24 }
0x2996   :  { %4842 = vmatprep.subr.bf16.mxu0 %v4979_v5 }
0x2a63   :  { %v3484_v42 = vpop.f32.mrb[36].mxu0  ;;  %v3671_v56 = vpop.f32.mrb[42].mxu1 }
0x2a64   :  { %v3488_v19 = vadd.f32 %v3484_v42, %v5251_v62  ;;  %v4592_v43 = vpop.f32.mrb[37].mxu0  ;;  %v4610_v29 = vpop.f32.mrb[43].mxu1 }
0x2a66   :  { %v3489_v49 = vsel %vm525_vm6, %v3488_v19, -inf }
0x2a67   :  { %3490 = vmax.xlane.f32.xlu1 %v3489_v49 }
0x2af4   :  { %v3491_v50 = vpop.xlane.xlu1 %3490 }
0x2af5   :  { %v3492_v52 = vsub.f32 %v3488_v19, %v3491_v50 }
0x2af7   :  { %v3493_v44 = vmul.f32 1.442695, %v3492_v52 }
0x2af9   :  { %4915 = vpow2.f32 %v3493_v44 }
0x2b03   :  { %v4916_v51 = vpop.eup %4915 }
0x2b04   :  { %v3495_v53 = vsel %vm525_vm6, %v4916_v51, 0.0 }
0x2b05   :  { %3496 = vadd.xlane.f32.xlu0 %v3495_v53 }
0x2b92   :  { %v3497_v24 = vpop.xlane.xlu0 %3496 }
0x2b93   :  { %4917 = vrcp.f32 %v3497_v24 }
0x2b9d   :  { %v4918_v55 = vpop.eup %4917 }
0x2b9e   :  { %v3499_v57 = vmul.f32 %v4918_v55, %v4916_v51 }
0x2ba0   :  { %v3510_v61 = vrot.slane %v3499_v57, %v5271_v21  ;;  %v3503_v62 = vrot.slane %v3499_v57, %v5260_v14 }
0x2ba2   :  { %3512 = vbcast.lane.b32.xlu1 %v3510_v61, 256  ;;  %3505 = vbcast.lane.b32.xlu0 %v3503_v62, 256 }
0x2c14   :  { %v3513_v11 = vpop.permute.xlu1 %3512  ;;  %v3506_v47 = vpop.permute.xlu0 %3505 }
0x2c15   :  { %v3515_v0 = vmul.f32 %v3513_v11, %v5293_v30  ;;  %v3514_v1 = vmul.f32 %v3506_v47, %v5289_v27 }
0x2c17   :  { %v3523_v2 = vsel %vm293_vm4, %v3515_v0, 0.0  ;;  %v3516_v4 = vsel %vm293_vm4, %v3514_v1, 0.0 }
0x2c18   :  { %v3524_v6 = vrot.slane %v3523_v2, 4  ;;  %v3517_v60 = vrot.slane %v3516_v4, 4 }
0x2c1a   :  { %v3525_v34 = vadd.f32 %v3524_v6, %v3523_v2  ;;  %v3518_v8 = vadd.f32 %v3517_v60, %v3516_v4 }
0x2c1c   :  { %v3526_v10 = vrot.slane %v3525_v34, 2  ;;  %v3519_v21 = vrot.slane %v3518_v8, 2 }
0x2c1e   :  { %v3527_v63 = vadd.f32 %v3526_v10, %v3525_v34  ;;  %v3520_v14 = vadd.f32 %v3519_v21, %v3518_v8 }
0x2c20   :  { %v3528_v9 = vrot.slane %v3527_v63, 1  ;;  %v3521_v15 = vrot.slane %v3520_v14, 1 }
0x2c22   :  { %v3529_v28 = vadd.f32 %v3528_v9, %v3527_v63  ;;  %v3522_v16 = vadd.f32 %v3521_v15, %v3520_v14 }
0x2c24   :  { %v3532_v30 = vsel %vm569_vm7, %v3529_v28, %v3522_v16 }
0x2c25   :  { %4602 = vmatmul.mubr.msk.f32.vlgmr.msra.gmra.mrb[38].mxu0 %vm293_vm4, %v3532_v30 }
0x2c26   :  { %4844 = vmatpush3.bf16.msra.mxu0 %v5304_v54  ;;  %4626 = vmatprep.mubr.msk.f32.mxu0 %vm4980_vm0, %v4981_v13 }
0x2c27   :  { %4845 = vmatprep.subr.bf16.mxu0 %v4979_v5 }
0x2c2a   :  { %4847 = vmatpush3.bf16.msra.mxu0 %v5315_v59  ;;  %v4927_v59 = vld [vmem:[%s5798_s17] ss:$0 sm:$0xff] }
0x2c2d   :  { %4627 = vmatmul.mubr.msk.f32.vlgmr.msra.gmra.mrb[40].mxu0 %vm293_vm4, %v5684_v32 }
0x2cf8   :  { %v3601_v27 = vpop.f32.mrb[38].mxu0 }
0x2cf9   :  { %v3672_v17 = vadd.f32 %v3671_v56, %v3601_v27  ;;  %v4603_v18 = vpop.f32.mrb[39].mxu0 }
0x2cfb   :  { %v3675_v20 = vadd.f32 %v4926_v7, %v3672_v17 }
0x2cfd   :  { %v3676_v22 = vmax.f32 %v3675_v20, 0.0 }
0x2cff   :  { %4616 = vmatmul.mubr.msk.f32.vlgmr.msra.gmra.mrb[44].mxu1 %vm450_vm5, %v3676_v22 }
0x2d00   :  { %v3816_v54 = vpop.f32.mrb[40].mxu0  ;;  %4850 = vmatpush3.bf16.msra.mxu1 %v5373_v33  ;;  %4637 = vmatprep.mubr.msk.f32.mxu1 %vm4980_vm0, %v4981_v13  ;;  %v4928_v33 = vld [vmem:[%s5797_s16] ss:$0 sm:$0xff]  ;;  %s4985_s16 = smov [#allocation4]  }
0x2d01   :  { %v3817_v23 = vadd.f32 %v4927_v59, %v3816_v54  ;;  %v4628_v25 = vpop.f32.mrb[41].mxu0  ;;  %4851 = vmatprep.subr.bf16.mxu1 %v4979_v5  ;;  %s3944_s17 = sshll.u32 %s4985_s16, 4  ;;  %s3945_s17 = int_to_ptr.vmem [resolvable:$true] %s3944_s17 }
0x2d02   :  { %s4930_s24 = scalar_lea.vmem %s3945_s17, 32  ;;  %p4935_p1 = scmp.lt.s32.totalorder %s3945_s17, %s3945_s17 }
0x2d03   :  { %3828 = vrot.lane.b32.xlu1 %v3817_v23, %s4983_s25  ;;  %p4931_p0 = scmp.ne.s32.totalorder %s3945_s17, %s4930_s24  ;;  %p4936_p2 = scmp.lt.s32.totalorder %s4930_s24, %s4930_s24 }
0x2d04   :  { %4853 = vmatpush3.bf16.msra.mxu1 %v5379_v36 }
0x2d05   :  { %p4937_p3 = por %p4936_p2, %p4935_p1 }
0x2d07   :  { %p4938_p4 = pnand %p4937_p3, %p4931_p0 }
0x2d75   :  { %v3829_v58 = vpop.permute.xlu1 %3828 }
0x2dd2   :  { %v3746_v12 = vpop.f32.mrb[44].mxu1 }
0x2dd3   :  { %v3747_v31 = vadd.f32 %v4928_v33, %v3746_v12  ;;  %v4617_v3 = vpop.f32.mrb[45].mxu1 }
0x2dd5   :  { %v3820_v13 = vadd.f32 %v3817_v23, %v3747_v31 }
0x2dd7   :  { %v4019_v45 = vmul.f32 -1.442695, %v3820_v13 }
0x2dd9   :  { %4919 = vpow2.f32 %v4019_v45 }
0x2de3   :  { %v4920_v37 = vpop.eup %4919 }
0x2de4   :  { %v3824_v32 = vadd.f32 1.0, %v4920_v37 }
0x2de6   :  { %4921 = vrcp.f32 %v3824_v32 }
0x2df0   :  { %v4922_v35 = vpop.eup %4921 }
0x2df1   :  { %v3831_v5 = vmul.f32 %v4922_v35, %v3829_v58  ;;  %v3838_v40 = vsub.f32 1.0, %v4922_v35  ;;  %v3844_v46 = vmul.f32 %v4922_v35, %v5680_v26 }
0x2df3   :  { %3833 = vrot.lane.b32.xlu0 %v3831_v5, %s4983_s25 }
0x2e65   :  { %v3834_v38 = vpop.permute.xlu0 %3833 }
0x2e66   :  { %v3836_v36 = vadd.f32 %v3834_v38, %v3747_v31 }
0x2e68   :  { %4923 = vtanh.f32 %v3836_v36 }
0x2e72   :  { %v4924_v39 = vpop.eup %4923 }
0x2e73   :  { %3840 = vrot.lane.b32.xlu1 %v4924_v39, %s4984_s30 }
0x2ee5   :  { %v3841_v41 = vpop.permute.xlu1 %3840 }
0x2ee6   :  { %v3843_v48 = vmul.f32 %v3841_v41, %v3838_v40 }
0x2ee8   :  { %v3845_v42 = vadd.f32 %v3844_v46, %v3843_v48 }
0x2eea   :  { %3847 = vrot.lane.b32.xlu0 %v3845_v42, %s4984_s30 }
0x2f5c   :  { %v3848_v56 = vpop.permute.xlu0 %3847 }
0x2f5d   :  { %3925 = vst.msk [vmem:[#allocation4] sm:$0x3] %vm3924_vm14, %v3848_v56  ;;  %4638 = vmatmul.mubr.msk.f32.vlgmr.msra.gmra.mrb[46].mxu1 %vm293_vm4, %v3848_v56 }
0x2f5e   :  { %4941 = shalt.err (!%p4938_p4)
}
0x2f5f   :  { %s4942_s25 = scalar_lea.hbm %s5802_s21, 32 }
0x2f60   :  { %p4943_p5 = scmp.ne.s32.totalorder %s5802_s21, %s4942_s25  ;;  %p4946_p6 = scmp.lt.u32.totalorder %s4942_s25, %s5802_s21 }
0x2f62   :  { %p4948_p7 = pnand %p4946_p6, %p4943_p5 }
0x2f64   :  { %4951 = shalt.err (!%p4948_p7)
}
0x2f65   :  { %3947 = dma.vmem_to_hbm [thread:$0]  %s3945_s17, 32, %s5802_s21, [#allocation5]   ;;  %v4929_v19 = vld [vmem:[%s5800_s19] ss:$0 sm:$0xff] }
0x2f66   :  { %s4986_s12 = smov [#allocation2]  }
0x2f67   :  { %s3931_s0 = sshll.u32 %s4986_s12, 4  ;;  %s3932_s0 = int_to_ptr.vmem [resolvable:$true] %s3931_s0 }
0x2f68   :  { %s4952_s30 = scalar_lea.vmem %s3932_s0, 192  ;;  %p4957_p9 = scmp.lt.s32.totalorder %s3932_s0, %s3932_s0 }
0x2f69   :  { %p4953_p8 = scmp.ne.s32.totalorder %s3932_s0, %s4952_s30  ;;  %p4958_p10 = scmp.lt.s32.totalorder %s4952_s30, %s4952_s30 }
0x2f6b   :  { %p4959_p11 = por %p4958_p10, %p4957_p9 }
0x2f6d   :  { %p4960_p12 = pnand %p4959_p11, %p4953_p8 }
0x3030   :  { %v3917_v26 = vpop.f32.mrb[46].mxu1 }
0x3031   :  { %v3918_v43 = vadd.f32 %v4929_v19, %v3917_v26  ;;  %v4639_v29 = vpop.f32.mrb[47].mxu1 }
0x3033   :  { %3922 = vst [vmem:[#allocation2 + $0xa] sm:$0x3] %v3918_v43 }
0x3034   :  { %4963 = shalt.err (!%p4960_p12)
}
0x3035   :  { %s4964_s22 = scalar_lea.hbm %s5801_s20, 192 }
0x3036   :  { %p4965_p13 = scmp.ne.s32.totalorder %s5801_s20, %s4964_s22  ;;  %p4968_p0 = scmp.lt.u32.totalorder %s4964_s22, %s5801_s20 }
0x3038   :  { %p4970_p1 = pnand %p4968_p0, %p4965_p13 }
0x303a   :  { %4973 = shalt.err (!%p4970_p1)
}
0x303b   :  { %s4987_s11 = smov 2  }
0x303c   :  { %3937 = dma.vmem_to_hbm [thread:$0]  %s3932_s0, 192, %s5801_s20, [#allocation3], %s4982_s1, %s4982_s1, %s4987_s11  }
0x303d   :  { %4974 = dma.done.wait [#allocation3], 192  }
0x303e   :  { %4975 = vsyncadd [#allocation3], 4294967104 }
0x303f   :  { %4976 = dma.done.wait [#allocation5], 32  }
0x3040   :  { %4977 = vsyncadd [#allocation5], 4294967264 }
0x3041   :  { %3954 = vsyncpa [#allocation3], 1 }
0x3042   :  { %3955 = vsyncpa [#allocation5], 1 }

</bundles_post_ra>
